<compile_context>
chip_gen: v5e
topology: v5e:2x2
jax: 0.10.0
libtpu: 0.0.40
codegen_flags: <defaults>
</compile_context>

<pallas_src>
import jax
import jax.numpy as jnp
from jax import lax
from jax.experimental import pallas as pl
from jax.experimental.pallas import tpu as pltpu

LN_EPS = 1e-5  # torch.nn.LayerNorm default


# ---------------------------------------------------------------------------
# Kernels
# ---------------------------------------------------------------------------
def _ln_epilogue(z, g_ref, beta_ref, o_ref):
    """Single-pass LayerNorm over the lane axis + fused affine (f32 stats).

    var = E[z^2] - E[z]^2 saves one full-tile pass vs. the two-pass form and
    the gamma/beta epilogue is fused into a single z*scale + shift expression
    (keeps v5e's single vector-store slot from saturating).
    """
    d = z.shape[-1]
    inv_d = jnp.float32(1.0 / d)
    mean = jnp.sum(z, axis=-1, keepdims=True) * inv_d
    ex2 = jnp.sum(z * z, axis=-1, keepdims=True) * inv_d
    var = jnp.maximum(ex2 - mean * mean, 0.0)
    rstd = lax.rsqrt(var + LN_EPS)                        # EUP slot
    scale = rstd * g_ref[...].astype(jnp.float32)         # (TM,1)*(1,D)
    shift = beta_ref[...].astype(jnp.float32) - mean * scale
    o_ref[...] = (z * scale + shift).astype(o_ref.dtype)


def residual_resident_kernel(x_ref, wt_ref, b_ref, g_ref, beta_ref, o_ref):
    # x_ref:    (TM, D)  row tile of the residual / sublayer input (streamed)
    # wt_ref:   (D, D)   Linear weight PRE-TRANSPOSED to (in, out), resident
    # b_ref:    (1, D)   Linear bias
    # g_ref:    (1, D)   LayerNorm gamma
    # beta_ref: (1, D)   LayerNorm beta
    x = x_ref[...]  # native dtype straight to the MXU, f32 accumulation
    y = jnp.dot(x, wt_ref[...], preferred_element_type=jnp.float32)
    y = y + b_ref[...].astype(jnp.float32)
    # TODO(synk): nn.Dropout(p=0.1) in training mode needs per-tile RNG
    # (pltpu.prng_seed + pltpu.prng_random_bits); eval-mode identity here.
    z = y + x.astype(jnp.float32)
    _ln_epilogue(z, g_ref, beta_ref, o_ref)


def residual_ktiled_kernel(xk_ref, xfull_ref, wt_ref, b_ref, g_ref, beta_ref,
                           o_ref, acc_ref):
    # Fallback for weights too large to keep VMEM-resident (v7x 64 MiB):
    # grid = (row_tiles, k_tiles); the contraction axis is tiled and
    # accumulated into an f32 VMEM scratch, LN runs on the last k step.
    # xk_ref:    (TM, TK) k-th input-feature slab of the row tile
    # xfull_ref: (TM, D)  full row tile (for the residual add), k-invariant
    # wt_ref:    (TK, D)  k-th slab of the pre-transposed (in, out) weight
    k = pl.program_id(1)

    @pl.when(k == 0)
    def _():
        acc_ref[...] = jnp.zeros_like(acc_ref)

    acc_ref[...] += jnp.dot(xk_ref[...], wt_ref[...],
                            preferred_element_type=jnp.float32)

    @pl.when(k == pl.num_programs(1) - 1)
    def _():
        # TODO(synk): training-mode dropout would mask here before the add.
        z = (acc_ref[...] + xfull_ref[...].astype(jnp.float32)
             + b_ref[...].astype(jnp.float32))
        _ln_epilogue(z, g_ref, beta_ref, o_ref)


# ---------------------------------------------------------------------------
# Wrapper
# ---------------------------------------------------------------------------
def _round_up(v, m):
    return ((v + m - 1) // m) * m


def _spec(shape, index_map, single_buffer):
    """BlockSpec with optional single-buffering for grid-invariant operands."""
    if single_buffer:
        try:
            return pl.BlockSpec(shape, index_map, pipeline_mode=pl.Buffered(1))
        except Exception:  # pipeline_mode / Buffered unsupported -> default
            pass
    return pl.BlockSpec(shape, index_map)


def residual_forward(x, w, b, gamma, beta, *, tm=512, tk=512,
                     force_k_tiled=False, single_buffer_params=True,
                     vmem_budget_bytes=56 << 20):
    """x: (B, S, D). w: (D, D) torch-layout Linear weight (out, in)."""
    B, S, D = x.shape
    assert D % 128 == 0, "dim must be a multiple of 128 (TPU lane width)"
    R = B * S

    x_item = jnp.dtype(x.dtype).itemsize
    w_item = jnp.dtype(w.dtype).itemsize
    align = 8 if x_item >= 4 else (16 if x_item == 2 else 32)

    # Row tile: large (HBM-streaming bound), multiple of the sublane packing,
    # rows padded (never shrink TM to odd sizes), and capped so the grid has
    # >= 2 tiles (v7x megacore sharding of the "parallel" axis).
    TM = max(align, min(int(tm), _round_up(R, align)))
    TM = (TM // align) * align
    if R >= 2 * align:
        TM = min(TM, _round_up(pl.cdiv(R, 2), align))
    n_row = pl.cdiv(R, TM)
    R_pad = n_row * TM

    x2 = x.reshape(R, D)
    if R_pad != R:
        x2 = jnp.pad(x2, ((0, R_pad - R), (0, 0)))  # zero rows, sliced off below
    b2 = b.reshape(1, D)
    g2 = gamma.reshape(1, D)
    beta2 = beta.reshape(1, D)

    # Pre-transpose the torch (out, in) weight ONCE on the host side: removes
    # any per-grid-step weight transpose inside the kernel; the single D*D HBM
    # pass is negligible next to the activation stream.
    wt = jnp.asarray(w).T  # (in, out)

    w_bytes = D * D * w_item
    stream_bytes = 2 * TM * D * x_item * 2  # x + out, double-buffered
    use_ktiled = force_k_tiled or (
        w_bytes + stream_bytes + (8 << 20) > vmem_budget_bytes)

    if not use_ktiled:
        def call(sb):
            vmem_need = ((1 if sb else 2) * w_bytes + stream_bytes
                         + (1 if sb else 2) * 3 * D * 4)
            vmem_limit = min(int(1.25 * vmem_need) + (8 << 20),
                             vmem_budget_bytes)
            return pl.pallas_call(
                residual_resident_kernel,
                out_shape=jax.ShapeDtypeStruct((R_pad, D), x.dtype),
                grid_spec=pltpu.PrefetchScalarGridSpec(
                    num_scalar_prefetch=0,
                    grid=(n_row,),
                    in_specs=[
                        pl.BlockSpec((TM, D), lambda i: (i, 0)),  # x (streamed)
                        _spec((D, D), lambda i: (0, 0), sb),      # weight
                        _spec((1, D), lambda i: (0, 0), sb),      # bias
                        _spec((1, D), lambda i: (0, 0), sb),      # gamma
                        _spec((1, D), lambda i: (0, 0), sb),      # beta
                    ],
                    out_specs=pl.BlockSpec((TM, D), lambda i: (i, 0)),
                ),
                compiler_params=pltpu.CompilerParams(
                    dimension_semantics=("parallel",),
                    vmem_limit_bytes=vmem_limit,
                ),
            )(x2, wt, b2, g2, beta2)
    else:
        TK = max(128, min(int(tk), D))
        TK = (TK // 128) * 128
        while D % TK != 0:
            TK -= 128
        n_k = D // TK

        def call(sb):
            vmem_need = (2 * TM * TK * x_item      # x k-slabs
                         + 2 * TM * D * x_item     # full x row tile (residual)
                         + 2 * TK * D * w_item     # weight slabs
                         + 2 * TM * D * x_item     # output
                         + TM * D * 4              # f32 accumulator
                         + (1 if sb else 2) * 3 * D * 4)
            vmem_limit = min(int(1.25 * vmem_need) + (8 << 20),
                             vmem_budget_bytes)
            return pl.pallas_call(
                residual_ktiled_kernel,
                out_shape=jax.ShapeDtypeStruct((R_pad, D), x.dtype),
                grid_spec=pltpu.PrefetchScalarGridSpec(
                    num_scalar_prefetch=0,
                    grid=(n_row, n_k),
                    in_specs=[
                        pl.BlockSpec((TM, TK), lambda i, k: (i, k)),  # x slab
                        pl.BlockSpec((TM, D), lambda i, k: (i, 0)),   # x full
                        pl.BlockSpec((TK, D), lambda i, k: (k, 0)),   # weight
                        _spec((1, D), lambda i, k: (0, 0), sb),       # bias
                        _spec((1, D), lambda i, k: (0, 0), sb),       # gamma
                        _spec((1, D), lambda i, k: (0, 0), sb),       # beta
                    ],
                    out_specs=pl.BlockSpec((TM, D), lambda i, k: (i, 0)),
                    scratch_shapes=[pltpu.VMEM((TM, D), jnp.float32)],
                ),
                compiler_params=pltpu.CompilerParams(
                    dimension_semantics=("parallel", "arbitrary"),
                    vmem_limit_bytes=vmem_limit,
                ),
            )(x2, x2, wt, b2, g2, beta2)

    try:
        out2 = call(single_buffer_params)
    except Exception:
        out2 = call(False)  # retry with default double-buffering
    return out2[:R].reshape(B, S, D)


# ---------------------------------------------------------------------------
# Pure-JAX reference (matches the torch module in eval mode)
# ---------------------------------------------------------------------------
def residual_reference(x, w, b, gamma, beta):
    y = jnp.einsum("bsd,od->bso", x, w) + b
    z = y + x
    mean = jnp.mean(z, axis=-1, keepdims=True)
    var = jnp.mean((z - mean) ** 2, axis=-1, keepdims=True)
    zn = (z - mean) / jnp.sqrt(var + LN_EPS)
    return zn * gamma + beta


def _make_inputs(key, B, S, D):
    kx, kw, kb = jax.random.split(key, 3)
    x = jax.random.normal(kx, (B, S, D), dtype=jnp.float32)
    bound = 1.0 / (D ** 0.5)  # torch Linear default init
    w = jax.random.uniform(kw, (D, D), minval=-bound, maxval=bound,
                           dtype=jnp.float32)
    b = jax.random.uniform(kb, (D,), minval=-bound, maxval=bound,
                           dtype=jnp.float32)
    gamma = jnp.ones((D,), jnp.float32)   # LayerNorm weight init
    beta = jnp.zeros((D,), jnp.float32)   # LayerNorm bias init
    return x, w, b, gamma, beta


if __name__ == "__main__":
    key = jax.random.PRNGKey(0)
    k1, k2, k3 = jax.random.split(key, 3)

    # 1) Resident-weight fast path (lane-dense shapes, 2 row tiles).
    x, w, b, g, bt = _make_inputs(k1, 2, 128, 128)
    out = residual_forward(x, w, b, g, bt, tm=512)
    jax.block_until_ready(out)
    ref = residual_reference(x, w, b, g, bt)
    assert out.shape == ref.shape
    assert jnp.allclose(out, ref, atol=2e-4, rtol=2e-4), "resident path mismatch"

    # 2) Ragged row count -> exercises padding + multiple-of-8 TM selection.
    x, w, b, g, bt = _make_inputs(k2, 2, 100, 128)
    out = residual_forward(x, w, b, g, bt, tm=512)
    jax.block_until_ready(out)
    ref = residual_reference(x, w, b, g, bt)
    assert jnp.allclose(out, ref, atol=2e-4, rtol=2e-4), "padded path mismatch"

    # 3) K-tiled fallback path (used automatically when the weight would not
    #    fit VMEM on v7x; forced here at small shape to verify correctness).
    x, w, b, g, bt = _make_inputs(k3, 2, 64, 256)
    out = residual_forward(x, w, b, g, bt, tm=128, tk=128, force_k_tiled=True)
    jax.block_until_ready(out)
    ref = residual_reference(x, w, b, g, bt)
    assert jnp.allclose(out, ref, atol=2e-4, rtol=2e-4), "k-tiled path mismatch"

    print("KERNEL_OK")
</pallas_src>

<mosaic_0001>
module attributes {stable_mosaic.version = 11 : i64} {
  func.func @residual_resident_kernel(%arg0: i32, %arg1: memref<128x128xf32, #tpu.memory_space<vmem>>, %arg2: memref<128x128xf32, #tpu.memory_space<vmem>>, %arg3: memref<1x128xf32, #tpu.memory_space<vmem>>, %arg4: memref<1x128xf32, #tpu.memory_space<vmem>>, %arg5: memref<1x128xf32, #tpu.memory_space<vmem>>, %arg6: memref<128x128xf32, #tpu.memory_space<vmem>>) attributes {dimension_semantics = [#tpu.dimension_semantics<parallel>], iteration_bounds = array<i64: 2>, scalar_prefetch = 0 : i64, scratch_operands = 0 : i64, tpu.core_type = #tpu.core_type<tc>, window_params = [{transform_indices = @transform_0, window_bounds = array<i64: 128, 128>}, {pipeline_mode = #tpu.pipeline_mode<synchronous>, transform_indices = @transform_1, window_bounds = array<i64: 128, 128>}, {pipeline_mode = #tpu.pipeline_mode<synchronous>, transform_indices = @transform_2, window_bounds = array<i64: 1, 128>}, {pipeline_mode = #tpu.pipeline_mode<synchronous>, transform_indices = @transform_3, window_bounds = array<i64: 1, 128>}, {pipeline_mode = #tpu.pipeline_mode<synchronous>, transform_indices = @transform_4, window_bounds = array<i64: 1, 128>}, {transform_indices = @transform_5, window_bounds = array<i64: 128, 128>}]} {
    %c0 = arith.constant 0 : index
    %c0_0 = arith.constant 0 : index
    %0 = vector.load %arg1[%c0, %c0_0] : memref<128x128xf32, #tpu.memory_space<vmem>>, vector<128x128xf32>
    %c0_1 = arith.constant 0 : index
    %c0_2 = arith.constant 0 : index
    %1 = vector.load %arg2[%c0_1, %c0_2] : memref<128x128xf32, #tpu.memory_space<vmem>>, vector<128x128xf32>
    %cst = arith.constant dense<0.000000e+00> : vector<128x128xf32>
    %2 = tpu.matmul %0, %1, %cst {dimension_numbers = #tpu.dot_dimension_numbers<[1], [0], [0], [1], [0, 0, 1, 1], [], []>} : vector<128x128xf32>, vector<128x128xf32>, vector<128x128xf32> -> vector<128x128xf32>
    %c0_3 = arith.constant 0 : index
    %c0_4 = arith.constant 0 : index
    %3 = vector.load %arg3[%c0_3, %c0_4] : memref<1x128xf32, #tpu.memory_space<vmem>>, vector<1x128xf32>
    %4 = vector.broadcast %3 : vector<1x128xf32> to vector<128x128xf32>
    %5 = arith.addf %2, %4 : vector<128x128xf32>
    %6 = arith.addf %5, %0 : vector<128x128xf32>
    %cst_5 = arith.constant dense<0.000000e+00> : vector<128xf32>
    %7 = vector.multi_reduction <add>, %6, %cst_5 [1] : vector<128x128xf32> to vector<128xf32>
    %8 = vector.shape_cast %7 : vector<128xf32> to vector<128x1xf32>
    %cst_6 = arith.constant 7.812500e-03 : f32
    %9 = vector.broadcast %cst_6 : f32 to vector<128x1xf32>
    %10 = arith.mulf %8, %9 : vector<128x1xf32>
    %11 = arith.mulf %6, %6 : vector<128x128xf32>
    %cst_7 = arith.constant dense<0.000000e+00> : vector<128xf32>
    %12 = vector.multi_reduction <add>, %11, %cst_7 [1] : vector<128x128xf32> to vector<128xf32>
    %13 = vector.shape_cast %12 : vector<128xf32> to vector<128x1xf32>
    %cst_8 = arith.constant 7.812500e-03 : f32
    %14 = vector.broadcast %cst_8 : f32 to vector<128x1xf32>
    %15 = arith.mulf %13, %14 : vector<128x1xf32>
    %16 = arith.mulf %10, %10 : vector<128x1xf32>
    %17 = arith.subf %15, %16 : vector<128x1xf32>
    %cst_9 = arith.constant 0.000000e+00 : f32
    %18 = vector.broadcast %cst_9 : f32 to vector<128x1xf32>
    %19 = arith.maximumf %17, %18 : vector<128x1xf32>
    %cst_10 = arith.constant 9.99999974E-6 : f32
    %20 = vector.broadcast %cst_10 : f32 to vector<128x1xf32>
    %21 = arith.addf %19, %20 : vector<128x1xf32>
    %22 = math.rsqrt %21 : vector<128x1xf32>
    %c0_11 = arith.constant 0 : index
    %c0_12 = arith.constant 0 : index
    %23 = vector.load %arg4[%c0_11, %c0_12] : memref<1x128xf32, #tpu.memory_space<vmem>>, vector<1x128xf32>
    %24 = vector.broadcast %22 : vector<128x1xf32> to vector<128x128xf32>
    %25 = vector.broadcast %23 : vector<1x128xf32> to vector<128x128xf32>
    %26 = arith.mulf %24, %25 : vector<128x128xf32>
    %c0_13 = arith.constant 0 : index
    %c0_14 = arith.constant 0 : index
    %27 = vector.load %arg5[%c0_13, %c0_14] : memref<1x128xf32, #tpu.memory_space<vmem>>, vector<1x128xf32>
    %28 = vector.broadcast %10 : vector<128x1xf32> to vector<128x128xf32>
    %29 = arith.mulf %28, %26 : vector<128x128xf32>
    %30 = vector.broadcast %27 : vector<1x128xf32> to vector<128x128xf32>
    %31 = arith.subf %30, %29 : vector<128x128xf32>
    %32 = arith.mulf %6, %26 : vector<128x128xf32>
    %33 = arith.addf %32, %31 : vector<128x128xf32>
    %c0_15 = arith.constant 0 : index
    %c0_16 = arith.constant 0 : index
    %34 = vector.load %arg6[%c0_15, %c0_16] : memref<128x128xf32, #tpu.memory_space<vmem>>, vector<128x128xf32>
    tpu.vector_store %arg6[%c0_15, %c0_16], %33 {strides = array<i32>} : memref<128x128xf32, #tpu.memory_space<vmem>>, vector<128x128xf32>,
    return
  }
  func.func @transform_0(%arg0: i32) -> (i32, i32) {
    %c0_i32 = arith.constant 0 : i32
    %c0_i32_0 = arith.constant 0 : i32
    return %arg0, %c0_i32 : i32, i32
  }
  func.func @transform_1(%arg0: i32) -> (i32, i32) {
    %c0_i32 = arith.constant 0 : i32
    %c0_i32_0 = arith.constant 0 : i32
    %c0_i32_1 = arith.constant 0 : i32
    return %c0_i32, %c0_i32_0 : i32, i32
  }
  func.func @transform_2(%arg0: i32) -> (i32, i32) {
    %c0_i32 = arith.constant 0 : i32
    %c0_i32_0 = arith.constant 0 : i32
    %c0_i32_1 = arith.constant 0 : i32
    return %c0_i32, %c0_i32_0 : i32, i32
  }
  func.func @transform_3(%arg0: i32) -> (i32, i32) {
    %c0_i32 = arith.constant 0 : i32
    %c0_i32_0 = arith.constant 0 : i32
    %c0_i32_1 = arith.constant 0 : i32
    return %c0_i32, %c0_i32_0 : i32, i32
  }
  func.func @transform_4(%arg0: i32) -> (i32, i32) {
    %c0_i32 = arith.constant 0 : i32
    %c0_i32_0 = arith.constant 0 : i32
    %c0_i32_1 = arith.constant 0 : i32
    return %c0_i32, %c0_i32_0 : i32, i32
  }
  func.func @transform_5(%arg0: i32) -> (i32, i32) {
    %c0_i32 = arith.constant 0 : i32
    %c0_i32_0 = arith.constant 0 : i32
    return %arg0, %c0_i32 : i32, i32
  }
}

module attributes {stable_mosaic.version = 11 : i64} {
  func.func @residual_resident_kernel(%arg0: i32, %arg1: memref<128x128xf32, #tpu.memory_space<vmem>>, %arg2: memref<128x128xf32, #tpu.memory_space<vmem>>, %arg3: memref<1x128xf32, #tpu.memory_space<vmem>>, %arg4: memref<1x128xf32, #tpu.memory_space<vmem>>, %arg5: memref<1x128xf32, #tpu.memory_space<vmem>>, %arg6: memref<128x128xf32, #tpu.memory_space<vmem>>) attributes {dimension_semantics = [#tpu.dimension_semantics<parallel>], iteration_bounds = array<i64: 2>, scalar_prefetch = 0 : i64, scratch_operands = 0 : i64, tpu.core_type = #tpu.core_type<tc>, window_params = [{transform_indices = @transform_0, window_bounds = array<i64: 128, 128>}, {pipeline_mode = #tpu.pipeline_mode<synchronous>, transform_indices = @transform_1, window_bounds = array<i64: 128, 128>}, {pipeline_mode = #tpu.pipeline_mode<synchronous>, transform_indices = @transform_2, window_bounds = array<i64: 1, 128>}, {pipeline_mode = #tpu.pipeline_mode<synchronous>, transform_indices = @transform_3, window_bounds = array<i64: 1, 128>}, {pipeline_mode = #tpu.pipeline_mode<synchronous>, transform_indices = @transform_4, window_bounds = array<i64: 1, 128>}, {transform_indices = @transform_5, window_bounds = array<i64: 128, 128>}]} {
    %c0 = arith.constant 0 : index
    %c0_0 = arith.constant 0 : index
    %0 = vector.load %arg1[%c0, %c0_0] : memref<128x128xf32, #tpu.memory_space<vmem>>, vector<128x128xf32>
    %c0_1 = arith.constant 0 : index
    %c0_2 = arith.constant 0 : index
    %1 = vector.load %arg2[%c0_1, %c0_2] : memref<128x128xf32, #tpu.memory_space<vmem>>, vector<128x128xf32>
    %cst = arith.constant dense<0.000000e+00> : vector<128x128xf32>
    %2 = tpu.matmul %0, %1, %cst {dimension_numbers = #tpu.dot_dimension_numbers<[1], [0], [0], [1], [0, 0, 1, 1], [], []>} : vector<128x128xf32>, vector<128x128xf32>, vector<128x128xf32> -> vector<128x128xf32>
    %c0_3 = arith.constant 0 : index
    %c0_4 = arith.constant 0 : index
    %3 = vector.load %arg3[%c0_3, %c0_4] : memref<1x128xf32, #tpu.memory_space<vmem>>, vector<1x128xf32>
    %4 = vector.broadcast %3 : vector<1x128xf32> to vector<128x128xf32>
    %5 = arith.addf %2, %4 : vector<128x128xf32>
    %6 = arith.addf %5, %0 : vector<128x128xf32>
    %cst_5 = arith.constant dense<0.000000e+00> : vector<128xf32>
    %7 = vector.multi_reduction <add>, %6, %cst_5 [1] : vector<128x128xf32> to vector<128xf32>
    %8 = vector.shape_cast %7 : vector<128xf32> to vector<128x1xf32>
    %cst_6 = arith.constant 7.812500e-03 : f32
    %9 = vector.broadcast %cst_6 : f32 to vector<128x1xf32>
    %10 = arith.mulf %8, %9 : vector<128x1xf32>
    %11 = arith.mulf %6, %6 : vector<128x128xf32>
    %cst_7 = arith.constant dense<0.000000e+00> : vector<128xf32>
    %12 = vector.multi_reduction <add>, %11, %cst_7 [1] : vector<128x128xf32> to vector<128xf32>
    %13 = vector.shape_cast %12 : vector<128xf32> to vector<128x1xf32>
    %cst_8 = arith.constant 7.812500e-03 : f32
    %14 = vector.broadcast %cst_8 : f32 to vector<128x1xf32>
    %15 = arith.mulf %13, %14 : vector<128x1xf32>
    %16 = arith.mulf %10, %10 : vector<128x1xf32>
    %17 = arith.subf %15, %16 : vector<128x1xf32>
    %cst_9 = arith.constant 0.000000e+00 : f32
    %18 = vector.broadcast %cst_9 : f32 to vector<128x1xf32>
    %19 = arith.maximumf %17, %18 : vector<128x1xf32>
    %cst_10 = arith.constant 9.99999974E-6 : f32
    %20 = vector.broadcast %cst_10 : f32 to vector<128x1xf32>
    %21 = arith.addf %19, %20 : vector<128x1xf32>
    %22 = math.rsqrt %21 : vector<128x1xf32>
    %c0_11 = arith.constant 0 : index
    %c0_12 = arith.constant 0 : index
    %23 = vector.load %arg4[%c0_11, %c0_12] : memref<1x128xf32, #tpu.memory_space<vmem>>, vector<1x128xf32>
    %24 = vector.broadcast %22 : vector<128x1xf32> to vector<128x128xf32>
    %25 = vector.broadcast %23 : vector<1x128xf32> to vector<128x128xf32>
    %26 = arith.mulf %24, %25 : vector<128x128xf32>
    %c0_13 = arith.constant 0 : index
    %c0_14 = arith.constant 0 : index
    %27 = vector.load %arg5[%c0_13, %c0_14] : memref<1x128xf32, #tpu.memory_space<vmem>>, vector<1x128xf32>
    %28 = vector.broadcast %10 : vector<128x1xf32> to vector<128x128xf32>
    %29 = arith.mulf %28, %26 : vector<128x128xf32>
    %30 = vector.broadcast %27 : vector<1x128xf32> to vector<128x128xf32>
    %31 = arith.subf %30, %29 : vector<128x128xf32>
    %32 = arith.mulf %6, %26 : vector<128x128xf32>
    %33 = arith.addf %32, %31 : vector<128x128xf32>
    %c0_15 = arith.constant 0 : index
    %c0_16 = arith.constant 0 : index
    %34 = vector.load %arg6[%c0_15, %c0_16] : memref<128x128xf32, #tpu.memory_space<vmem>>, vector<128x128xf32>
    tpu.vector_store %arg6[%c0_15, %c0_16], %33 {strides = array<i32>} : memref<128x128xf32, #tpu.memory_space<vmem>>, vector<128x128xf32>,
    return
  }
  func.func @transform_0(%arg0: i32) -> (i32, i32) {
    %c0_i32 = arith.constant 0 : i32
    %c0_i32_0 = arith.constant 0 : i32
    return %arg0, %c0_i32 : i32, i32
  }
  func.func @transform_1(%arg0: i32) -> (i32, i32) {
    %c0_i32 = arith.constant 0 : i32
    %c0_i32_0 = arith.constant 0 : i32
    %c0_i32_1 = arith.constant 0 : i32
    return %c0_i32, %c0_i32_0 : i32, i32
  }
  func.func @transform_2(%arg0: i32) -> (i32, i32) {
    %c0_i32 = arith.constant 0 : i32
    %c0_i32_0 = arith.constant 0 : i32
    %c0_i32_1 = arith.constant 0 : i32
    return %c0_i32, %c0_i32_0 : i32, i32
  }
  func.func @transform_3(%arg0: i32) -> (i32, i32) {
    %c0_i32 = arith.constant 0 : i32
    %c0_i32_0 = arith.constant 0 : i32
    %c0_i32_1 = arith.constant 0 : i32
    return %c0_i32, %c0_i32_0 : i32, i32
  }
  func.func @transform_4(%arg0: i32) -> (i32, i32) {
    %c0_i32 = arith.constant 0 : i32
    %c0_i32_0 = arith.constant 0 : i32
    %c0_i32_1 = arith.constant 0 : i32
    return %c0_i32, %c0_i32_0 : i32, i32
  }
  func.func @transform_5(%arg0: i32) -> (i32, i32) {
    %c0_i32 = arith.constant 0 : i32
    %c0_i32_0 = arith.constant 0 : i32
    return %arg0, %c0_i32 : i32, i32
  }
}

</mosaic_0001>

<bundles_post_ra>
// kernel: tpu_custom_call.1
= control target key start
LH: loop header
LB: loop body
LE: loop exit
PB: predicated region body
PF: predicated region fallthrough
CT: control target
= control target key end

     0   :  { %10 = vsyncpa [#allocation3], 0  ;;  %s1790_s0 = inlined_call_operand.hbm [shape: f32[256,128], index: 0, kind: input, shape index: {}]   ;;  %s1791_s1 = inlined_call_operand.hbm [shape: f32[128,128], index: 1, kind: input, shape index: {}]   ;;  %s1792_s2 = inlined_call_operand.vmem [shape: f32[1,128], index: 2, kind: input, shape index: {}]   ;;  %s1793_s3 = inlined_call_operand.vmem [shape: f32[1,128], index: 3, kind: input, shape index: {}]   ;;  %s1794_s4 = inlined_call_operand.vmem [shape: f32[1,128], index: 4, kind: input, shape index: {}]   ;;  %s1795_s5 = inlined_call_operand.hbm [shape: f32[256,128], index: 5, kind: output, shape index: {}]  }
   0x1   :  { %12 = vsyncpa [#allocation3 + $0x1], 0 }
   0x2   :  { %13 = vsyncpa [#allocation6], 0 }
   0x3   :  { %14 = vsyncpa [#allocation4], 0 }
   0x4   :  { %16 = vsyncpa [#allocation4 + $0x1], 0  ;;  %s1249_s18 = smov 0   ;;  %s1251_s19 = smov 0  }
   0x5   :  { %s1253_s20 = smov 0   ;;  %s1255_s21 = smov 0  }
   0x6 LB: > { %s1270_s22 = sadd.s32 4294967295, %s1212_s21   ;;  %s920_s23 = sadd.s32 4294967294, %s1212_s21   ;;  %s1212_s21 = sphi %s1255_s21, %s1807_s21   ;;  %s1208_s20 = sphi %s1253_s20, %s1806_s20   ;;  %s1204_s19 = sphi %s1251_s19, %s1805_s19   ;;  %s1200_s18 = sphi %s1249_s18, %s1804_s18  }
   0x7   : > { %p42_p0 = scmp.ne.s32.totalorder %s1204_s19, %s1200_s18  ;;  %p43_p1 = scmp.eq.s32.totalorder %s1270_s22, 0 }
   0x8   : > { %p150_p2 = scmp.eq.s32.totalorder %s1270_s22, 1  ;;  %p156_p3 = scmp.eq.s32.totalorder %s920_s23, 1 }
   0x9   : > { %p1279_p4 = por %p43_p1, %p42_p0  ;;  %p921_p5 = scmp.ge.s32.totalorder %s1212_s21, 1 }
   0xa   : > { %p1284_p6 = por %p156_p3, %p42_p0  ;;  %p163_p7 = scmp.lt.s32.totalorder %s1212_s21, 3 }
   0xb   : > { %s174_s28 = sshll.u32 %s1791_s1, 4  ;;  %s1214_s30 = smov [#allocation5]   ;;  %s175_s28 = int_to_ptr.hbm [resolvable:$true] %s174_s28 }
   0xc   : > { %p1292_p8 = pnand %p921_p5, %p163_p7  ;;  %s176_s6 = sshll.u32 %s1214_s30, 4  ;;  %s177_s6 = int_to_ptr.vmem [resolvable:$true] %s176_s6 }
   0xd   : > { %s1302_s7 = sadd.s32 1, %s1212_s21   ;;  %s1796_s8 = smov 128  }
   0xe   : > { %p994_p9 = pneg %p1292_p8  ;;  %s1216_s9 = smov 8  }
   0xf   : > { %s26_s10 = ssub.s32 %s1212_s21, %s1302_s7  ;;  %s29_s11 = sadd.s32 1, %s1208_s20 }
  0x10   : > { %p995_p10 = pnand %p994_p9, %p43_p1  ;;  %p27_p12 = scmp.eq.s32.totalorder %s26_s10, 0 }
  0x11   : > { %p36_p13 = scmp.ne.s32.totalorder %s1208_s20, %s1204_s19  ;;  %p37_p0 = scmp.eq.s32.totalorder %s1212_s21, 0 }
  0x12   : > { %997 = dma.hbm_to_vmem [thread:$0]  (!%p995_p10), %s175_s28, 2048, %s177_s6, [#allocation6], %s1796_s8, %s1796_s8, %s1216_s9  }
  0x13   : > { %s1314_s12 = scalar_select %p27_p12, %s1208_s20, %s29_s11  }
  0x14   : > { %p1318_p3 = por %p150_p2, %p36_p13  ;;  %p1007_p5 = scmp.lt.s32.totalorder %s1212_s21, 2 }
  0x15   : > { %s199_s14 = sand.u32 1, %s1208_s20   ;;  %s936_s15 = sshll.u32 %s1212_s21, 7 }
  0x16   : > { %p38_p7 = por %p37_p0, %p36_p13  ;;  %s924_s16 = sshll.u32 %s199_s14, 7 }
  0x17   : > { %s208_s26 = scalar_lea.hbm %s1790_s0, %s936_s15  ;;  %s203_s28 = scalar_lea.vmem [#allocation2], %s924_s16 }
  0x18   : > { %s209_s27 = sshll.u32 %s208_s26, 4  ;;  %s211_s30 = sshll.u32 %s203_s28, 4  ;;  %s210_s27 = int_to_ptr.hbm [resolvable:$true] %s209_s27  ;;  %s212_s30 = int_to_ptr.vmem [resolvable:$true] %s211_s30 }
  0x19   : > { %p1328_p9 = pnand %p1007_p5, %p38_p7  ;;  %s200_s10 = scalar_lea.sflag [#allocation3], %s199_s14 }
  0x1a   : > { %s1112_s11 = sshra.s32 %s210_s27, 4  ;;  %s1119_s16 = scalar_lea.hbm %s1790_s0, 256  ;;  %s1113_s11 = int_to_ptr.hbm [resolvable:$true] %s1112_s11 }
  0x1b   : > { %s1114_s8 = scalar_lea.hbm %s1113_s11, 128  ;;  %p1116_p10 = pneg %p1328_p9 }
  0x1c   : > { %p1115_p2 = scmp.ne.s32.totalorder %s1113_s11, %s1114_s8  ;;  %p1120_p0 = scmp.lt.s32.totalorder %s1113_s11, %s1790_s0 }
  0x1d   : > { %p1121_p5 = scmp.lt.s32.totalorder %s1119_s16, %s1114_s8 }
  0x1e   : > { %p1117_p12 = pnand %p1116_p10, %p1115_p2 }
  0x1f   : > { %p1122_p7 = por %p1121_p5, %p1120_p0 }
  0x20   : > { %p1118_p13 = pneg %p1117_p12 }
  0x22   : > { %p1123_p11 = pnand %p1122_p7, %p1118_p13 }
  0x24   : > { %1126 = shalt.err (!%p1123_p11)
}
  0x25   : > { %s1802_s14 = smov 128   ;;  %223 = sbr.rel (%p1292_p8) target bundleno = 445 (0x1bd), region = 40 }
  0x26   : > { %1001 = dma.hbm_to_vmem [thread:$0]  (!%p1328_p9), %s210_s27, 2048, %s212_s30, %s200_s10, %s1802_s14, %s1802_s14, %s1216_s9  }
  0x27   : > { %s1348_s28 = sand.u32 (!%p1292_p8), 1, %s1204_s19  }
  0x28   : > { %s928_s8 = sshll.u32 (!%p1292_p8), %s1348_s28, 7  ;;  %s226_s11 = scalar_lea.sflag (!%p1292_p8), [#allocation3], %s1348_s28 }
  0x29   : > { %s1354_s15 = scalar_lea.vmem (!%p1292_p8), [#allocation2], %s928_s8 }
  0x2a   : > { %1187 = dma.done.wait (%p1279_p4), %s226_s11, 2048  }
  0x2b   : > { %1189 = vsyncadd (%p1279_p4), %s226_s11, 4294965248 }
  0x2c   : > { %1191 = dma.done.wait (%p43_p1), [#allocation6], 2048  }
  0x2d   : > { %1193 = vsyncadd (%p43_p1), [#allocation6], 4294965248  ;;  %v295_v0 = vld [vmem:[#allocation5 + $0x78] sm:$0xff]  ;;  %v294_v1 = vld [vmem:[#allocation5 + $0x70] sm:$0xff]  ;;  %s1557_s10 = scalar_lea.vmem [#allocation7], %s928_s8  ;;  %s937_s17 = sshll.u32 %s1270_s22, 7 }
  0x2e   : > { %300 = vmatpush.msra.mxu0 %v295_v0  ;;  %938 = vmatpush.msra.mxu1 %v295_v0  ;;  %v293_v2 = vld [vmem:[#allocation5 + $0x68] sm:$0xff]  ;;  %v292_v3 = vld [vmem:[#allocation5 + $0x60] sm:$0xff]  ;;  %v291_v4 = vld [vmem:[#allocation5 + $0x58] sm:$0xff]  ;;  %s833_s26 = scalar_lea.hbm %s1795_s5, %s937_s17  ;;  %s834_s22 = sshll.u32 %s1557_s10, 4  ;;  %s835_s22 = int_to_ptr.vmem [resolvable:$true] %s834_s22 }
  0x2f   : > { %940 = vmatpush.msra.mxu3 %v295_v0  ;;  %939 = vmatpush.msra.mxu2 %v295_v0  ;;  %v290_v5 = vld [vmem:[#allocation5 + $0x50] sm:$0xff]  ;;  %v289_v6 = vld [vmem:[#allocation5 + $0x48] sm:$0xff]  ;;  %v288_v7 = vld [vmem:[#allocation5 + $0x40] sm:$0xff]  ;;  %s836_s14 = sshll.u32 %s833_s26, 4  ;;  %s822_s8 = scalar_lea.sflag [#allocation4], %s1348_s28  ;;  %s837_s14 = int_to_ptr.hbm [resolvable:$true] %s836_s14 }
  0x30   : > { %301 = vmatpush.msra.mxu0 %v294_v1  ;;  %941 = vmatpush.msra.mxu1 %v294_v1  ;;  %v287_v8 = vld [vmem:[#allocation5 + $0x38] sm:$0xff]  ;;  %v286_v9 = vld [vmem:[#allocation5 + $0x30] sm:$0xff]  ;;  %v285_v10 = vld [vmem:[#allocation5 + $0x28] sm:$0xff]  ;;  %s1156_s11 = sshra.s32 %s837_s14, 4  ;;  %s1162_s9 = scalar_lea.hbm %s1795_s5, 256  ;;  %s1157_s11 = int_to_ptr.hbm [resolvable:$true] %s1156_s11 }
  0x31   : > { %943 = vmatpush.msra.mxu3 %v294_v1  ;;  %942 = vmatpush.msra.mxu2 %v294_v1  ;;  %v284_v11 = vld [vmem:[#allocation5 + $0x20] sm:$0xff]  ;;  %v283_v12 = vld [vmem:[#allocation5 + $0x18] sm:$0xff]  ;;  %v282_v13 = vld [vmem:[#allocation5 + $0x10] sm:$0xff]  ;;  %p1163_p11 = scmp.lt.s32.totalorder %s1157_s11, %s1795_s5 }
  0x32   : > { %302 = vmatpush.msra.mxu0 %v293_v2  ;;  %944 = vmatpush.msra.mxu1 %v293_v2  ;;  %v281_v14 = vld [vmem:[#allocation5 + $0x8] sm:$0xff]  ;;  %v280_v15 = vld [vmem:[#allocation5] sm:$0xff]  ;;  %v266_v24 = vld [vmem:[%s1354_s15 + $0x10] sm:$0xff] }
  0x33   : > { %946 = vmatpush.msra.mxu3 %v293_v2  ;;  %945 = vmatpush.msra.mxu2 %v293_v2  ;;  %v264_v16 = vld [vmem:[%s1354_s15] sm:$0xff]  ;;  %v265_v20 = vld [vmem:[%s1354_s15 + $0x8] sm:$0xff]  ;;  %v1377_v25 = vld [vmem:[%s1354_s15 + $0x30] sm:$0xff] }
  0x34   : > { %303 = vmatpush.msra.mxu0 %v292_v3  ;;  %947 = vmatpush.msra.mxu1 %v292_v3  ;;  %v268_v17 = vld [vmem:[%s1354_s15 + $0x20] sm:$0xff]  ;;  %v269_v21 = vld [vmem:[%s1354_s15 + $0x28] sm:$0xff]  ;;  %v1380_v26 = vld [vmem:[%s1354_s15 + $0x70] sm:$0xff] }
  0x35   : > { %949 = vmatpush.msra.mxu3 %v292_v3  ;;  %948 = vmatpush.msra.mxu2 %v292_v3  ;;  %v276_v18 = vld [vmem:[%s1354_s15 + $0x60] sm:$0xff]  ;;  %v277_v22 = vld [vmem:[%s1354_s15 + $0x68] sm:$0xff]  ;;  %v1383_v27 = vld [vmem:[%s1354_s15 + $0x50] sm:$0xff] }
  0x36   : > { %304 = vmatpush.msra.mxu0 %v291_v4  ;;  %950 = vmatpush.msra.mxu1 %v291_v4  ;;  %v272_v19 = vld [vmem:[%s1354_s15 + $0x40] sm:$0xff]  ;;  %v1372_v23 = vld [vmem:[%s1354_s15 + $0x48] sm:$0xff]  ;;  %v1389_v28 = vld [vmem:[%s1354_s15 + $0x38] sm:$0xff] }
  0x37   : > { %952 = vmatpush.msra.mxu3 %v291_v4  ;;  %951 = vmatpush.msra.mxu2 %v291_v4  ;;  %v1392_v29 = vld [vmem:[%s1354_s15 + $0x18] sm:$0xff]  ;;  %v1407_v32 = vld [vmem:[%s1792_s2] ss:$0 sm:$0xff] }
  0x38   : > { %305 = vmatpush.msra.mxu0 %v290_v5  ;;  %953 = vmatpush.msra.mxu1 %v290_v5  ;;  %v1395_v30 = vld [vmem:[%s1354_s15 + $0x58] sm:$0xff] }
  0x39   : > { %955 = vmatpush.msra.mxu3 %v290_v5  ;;  %954 = vmatpush.msra.mxu2 %v290_v5  ;;  %v1398_v31 = vld [vmem:[%s1354_s15 + $0x78] sm:$0xff]  ;;  %s1158_s15 = scalar_lea.hbm %s1157_s11, 128 }
  0x3a   : > { %306 = vmatpush.msra.mxu0 %v289_v6  ;;  %956 = vmatpush.msra.mxu1 %v289_v6  ;;  %p1159_p1 = scmp.ne.s32.totalorder %s1157_s11, %s1158_s15  ;;  %p1164_p9 = scmp.lt.s32.totalorder %s1162_s9, %s1158_s15 }
  0x3b   : > { %958 = vmatpush.msra.mxu3 %v289_v6  ;;  %957 = vmatpush.msra.mxu2 %v289_v6 }
  0x3c   : > { %307 = vmatpush.msra.mxu0 %v288_v7  ;;  %959 = vmatpush.msra.mxu1 %v288_v7  ;;  %p1160_p4 = pnand %p1159_p1, %p1318_p3  ;;  %p1165_p2 = por %p1164_p9, %p1163_p11 }
  0x3d   : > { %961 = vmatpush.msra.mxu3 %v288_v7  ;;  %960 = vmatpush.msra.mxu2 %v288_v7 }
  0x3e   : > { %308 = vmatpush.msra.mxu0 %v287_v8  ;;  %962 = vmatpush.msra.mxu1 %v287_v8  ;;  %p1161_p8 = pneg %p1160_p4 }
  0x3f   : > { %964 = vmatpush.msra.mxu3 %v287_v8  ;;  %963 = vmatpush.msra.mxu2 %v287_v8 }
  0x40   : > { %309 = vmatpush.msra.mxu0 %v286_v9  ;;  %965 = vmatpush.msra.mxu1 %v286_v9  ;;  %p1166_p10 = pnand %p1165_p2, %p1161_p8 }
  0x41   : > { %967 = vmatpush.msra.mxu3 %v286_v9  ;;  %966 = vmatpush.msra.mxu2 %v286_v9 }
  0x42   : > { %310 = vmatpush.msra.mxu0 %v285_v10  ;;  %968 = vmatpush.msra.mxu1 %v285_v10 }
  0x43   : > { %970 = vmatpush.msra.mxu3 %v285_v10  ;;  %969 = vmatpush.msra.mxu2 %v285_v10 }
  0x44   : > { %311 = vmatpush.msra.mxu0 %v284_v11  ;;  %971 = vmatpush.msra.mxu1 %v284_v11 }
  0x45   : > { %973 = vmatpush.msra.mxu3 %v284_v11  ;;  %972 = vmatpush.msra.mxu2 %v284_v11 }
  0x46   : > { %312 = vmatpush.msra.mxu0 %v283_v12  ;;  %974 = vmatpush.msra.mxu1 %v283_v12 }
  0x47   : > { %976 = vmatpush.msra.mxu3 %v283_v12  ;;  %975 = vmatpush.msra.mxu2 %v283_v12 }
  0x48   : > { %313 = vmatpush.msra.mxu0 %v282_v13  ;;  %977 = vmatpush.msra.mxu1 %v282_v13 }
  0x49   : > { %979 = vmatpush.msra.mxu3 %v282_v13  ;;  %978 = vmatpush.msra.mxu2 %v282_v13 }
  0x4a   : > { %314 = vmatpush.msra.mxu0 %v281_v14  ;;  %980 = vmatpush.msra.mxu1 %v281_v14 }
  0x4b   : > { %982 = vmatpush.msra.mxu3 %v281_v14  ;;  %981 = vmatpush.msra.mxu2 %v281_v14 }
  0x4c   : > { %315 = vmatpush.msra.mxu0 %v280_v15  ;;  %983 = vmatpush.msra.mxu1 %v280_v15 }
  0x4d   : > { %316 = vmatmul.f32.vlgmr.msra.gmra.mxu0 %v264_v16  ;;  %328 = vmatmul.f32.vlgmr.msra.gmra.mxu1 %v268_v17 }
  0x4e   : > { %985 = vmatpush.msra.mxu3 %v280_v15  ;;  %984 = vmatpush.msra.mxu2 %v280_v15 }
  0x4f   : > { %352 = vmatmul.f32.vlgmr.msra.gmra.mxu3 %v276_v18  ;;  %340 = vmatmul.f32.vlgmr.msra.gmra.mxu2 %v272_v19 }
  0x55   : > { %319 = vmatmul.f32.gmra.mxu0 %v265_v20  ;;  %331 = vmatmul.f32.gmra.mxu1 %v269_v21 }
  0x57   : > { %355 = vmatmul.f32.gmra.mxu3 %v277_v22  ;;  %343 = vmatmul.f32.gmra.mxu2 %v1372_v23 }
  0x5d   : > { %322 = vmatmul.f32.gmra.mxu0 %v266_v24  ;;  %334 = vmatmul.f32.gmra.mxu1 %v1377_v25 }
  0x5f   : > { %358 = vmatmul.f32.gmra.mxu3 %v1380_v26  ;;  %346 = vmatmul.f32.gmra.mxu2 %v1383_v27 }
  0x65   : > { %337 = vmatmul.f32.gmra.mxu1 %v1389_v28  ;;  %325 = vmatmul.f32.gmra.mxu0 %v1392_v29 }
  0x67   : > { %349 = vmatmul.f32.gmra.mxu2 %v1395_v30  ;;  %361 = vmatmul.f32.gmra.mxu3 %v1398_v31 }
  0xca   : > { %v317_v33 = vpop.f32.mrf.mxu0  ;;  %v329_v34 = vpop.f32.mrf.mxu1 }
  0xcb   : > { %v318_v35 = vadd.f32 %v1407_v32, %v317_v33  ;;  %v330_v36 = vadd.f32 %v1407_v32, %v329_v34 }
  0xcd   : > { %v1411_v37 = vadd.f32 %v318_v35, %v264_v16  ;;  %v1413_v38 = vadd.f32 %v330_v36, %v268_v17 }
  0xcf   : > { %389 = vadd.xlane.f32.xlu2 %v1413_v38  ;;  %381 = vadd.xlane.f32.xlu0 %v1411_v37  ;;  %v429_v39 = vmul.f32 %v1411_v37, %v1411_v37  ;;  %v433_v42 = vmul.f32 %v1413_v38, %v1413_v38 }
  0xd1   : > { %445 = vadd.xlane.f32.xlu1 %v429_v39 }
  0xd2   : > { %v353_v40 = vpop.f32.mrf.mxu3  ;;  %v320_v43 = vpop.f32.mrf.mxu0 }
  0xd3   : > { %v354_v41 = vadd.f32 %v1407_v32, %v353_v40  ;;  %v341_v44 = vpop.f32.mrf.mxu2  ;;  %v321_v47 = vadd.f32 %v1407_v32, %v320_v43  ;;  %v332_v53 = vpop.f32.mrf.mxu1 }
  0xd4   : > { %v342_v48 = vadd.f32 %v1407_v32, %v341_v44  ;;  %v333_v56 = vadd.f32 %v1407_v32, %v332_v53 }
  0xd5   : > { %v1422_v45 = vadd.f32 %v354_v41, %v276_v18  ;;  %v1429_v50 = vadd.f32 %v321_v47, %v265_v20 }
  0xd6   : > { %v1431_v51 = vadd.f32 %v342_v48, %v272_v19  ;;  %v1441_v59 = vadd.f32 %v333_v56, %v269_v21 }
  0xd7   : > { %453 = vadd.xlane.f32.xlu2 %v433_v42  ;;  %405 = vadd.xlane.f32.xlu0 %v1422_v45  ;;  %v441_v46 = vmul.f32 %v1422_v45, %v1422_v45  ;;  %v430_v3 = vmul.f32 %v1429_v50, %v1429_v50 }
  0xd8   : > { %v437_v60 = vmul.f32 %v1431_v51, %v1431_v51  ;;  %v434_v1 = vmul.f32 %v1441_v59, %v1441_v59 }
  0xd9   : > { %469 = vadd.xlane.f32.xlu1 %v441_v46 }
  0xda   : > { %v356_v49 = vpop.f32.mrf.mxu3  ;;  %v323_v55 = vpop.f32.mrf.mxu0 }
  0xdb   : > { %v357_v52 = vadd.f32 %v1407_v32, %v356_v49  ;;  %v324_v57 = vadd.f32 %v1407_v32, %v323_v55  ;;  %v344_v58 = vpop.f32.mrf.mxu2  ;;  %v335_v0 = vpop.f32.mrf.mxu1 }
  0xdc   : > { %v345_v62 = vadd.f32 %v1407_v32, %v344_v58  ;;  %v336_v5 = vadd.f32 %v1407_v32, %v335_v0 }
  0xdd   : > { %v1434_v54 = vadd.f32 %v357_v52, %v277_v22  ;;  %v1445_v61 = vadd.f32 %v324_v57, %v266_v24 }
  0xde   : > { %v1451_v63 = vadd.f32 %v345_v62, %v1372_v23  ;;  %v1462_v8 = vadd.f32 %v336_v5, %v1377_v25 }
  0xdf   : > { %397 = vadd.xlane.f32.xlu2 %v1431_v51  ;;  %383 = vadd.xlane.f32.xlu0 %v1429_v50  ;;  %v431_v23 = vmul.f32 %v1445_v61, %v1445_v61 }
  0xe0   : > { %v438_v4 = vmul.f32 %v1451_v63, %v1451_v63  ;;  %v435_v11 = vmul.f32 %v1462_v8, %v1462_v8 }
  0xe1   : > { %407 = vadd.xlane.f32.xlu1 %v1434_v54 }
  0xe2   : > { %v359_v2 = vpop.f32.mrf.mxu3  ;;  %v326_v16 = vpop.f32.mrf.mxu0 }
  0xe3   : > { %v360_v6 = vadd.f32 %v1407_v32, %v359_v2  ;;  %v347_v7 = vpop.f32.mrf.mxu2  ;;  %v338_v13 = vpop.f32.mrf.mxu1  ;;  %v327_v18 = vadd.f32 %v1407_v32, %v326_v16 }
  0xe4   : > { %v348_v10 = vadd.f32 %v1407_v32, %v347_v7  ;;  %v339_v15 = vadd.f32 %v1407_v32, %v338_v13 }
  0xe5   : > { %v1465_v9 = vadd.f32 %v360_v6, %v1380_v26  ;;  %v1487_v22 = vadd.f32 %v327_v18, %v1392_v29  ;;  %v442_v29 = vmul.f32 %v1434_v54, %v1434_v54 }
  0xe6   : > { %v1473_v12 = vadd.f32 %v348_v10, %v1383_v27  ;;  %v1480_v17 = vadd.f32 %v339_v15, %v1389_v28 }
  0xe7   : > { %391 = vadd.xlane.f32.xlu2 %v1441_v59  ;;  %461 = vadd.xlane.f32.xlu0 %v437_v60 }
  0xe8   : > { %v439_v14 = vmul.f32 %v1473_v12, %v1473_v12  ;;  %v436_v19 = vmul.f32 %v1480_v17, %v1480_v17 }
  0xe9   : > { %385 = vadd.xlane.f32.xlu1 %v1445_v61 }
  0xea   : > { %v362_v21 = vpop.f32.mrf.mxu3 }
  0xeb   : > { %v350_v20 = vpop.f32.mrf.mxu2  ;;  %v363_v25 = vadd.f32 %v1407_v32, %v362_v21 }
  0xec   : > { %v351_v24 = vadd.f32 %v1407_v32, %v350_v20  ;;  %v1530_v20 = vld [vmem:[%s1793_s3] ss:$0 sm:$0xff] }
  0xed   : > { %v1498_v27 = vadd.f32 %v363_v25, %v1398_v31  ;;  %v443_v31 = vmul.f32 %v1465_v9, %v1465_v9 }
  0xee   : > { %v1495_v26 = vadd.f32 %v351_v24, %v1395_v30  ;;  %v432_v30 = vmul.f32 %v1487_v22, %v1487_v22 }
  0xef   : > { %447 = vadd.xlane.f32.xlu2 %v430_v3  ;;  %455 = vadd.xlane.f32.xlu0 %v434_v1  ;;  %v444_v32 = vmul.f32 %v1498_v27, %v1498_v27 }
  0xf0   : > { %v440_v28 = vmul.f32 %v1495_v26, %v1495_v26 }
  0xf1   : > { %463 = vadd.xlane.f32.xlu1 %v438_v4 }
  0xf7   : > { %409 = vadd.xlane.f32.xlu2 %v1465_v9  ;;  %399 = vadd.xlane.f32.xlu0 %v1451_v63 }
  0xf9   : > { %457 = vadd.xlane.f32.xlu1 %v435_v11 }
  0xff   : > { %465 = vadd.xlane.f32.xlu2 %v439_v14  ;;  %393 = vadd.xlane.f32.xlu0 %v1462_v8 }
 0x101   : > { %401 = vadd.xlane.f32.xlu1 %v1473_v12 }
 0x107   : > { %459 = vadd.xlane.f32.xlu2 %v436_v19  ;;  %449 = vadd.xlane.f32.xlu0 %v431_v23 }
 0x109   : > { %387 = vadd.xlane.f32.xlu1 %v1487_v22 }
 0x10f   : > { %403 = vadd.xlane.f32.xlu2 %v1495_v26  ;;  %411 = vadd.xlane.f32.xlu0 %v1498_v27 }
 0x111   : > { %395 = vadd.xlane.f32.xlu1 %v1480_v17 }
 0x117   : > { %471 = vadd.xlane.f32.xlu2 %v442_v29  ;;  %467 = vadd.xlane.f32.xlu0 %v440_v28 }
 0x119   : > { %451 = vadd.xlane.f32.xlu1 %v432_v30 }
 0x11f   : > { %473 = vadd.xlane.f32.xlu0 %v443_v31 }
 0x121   : > { %475 = vadd.xlane.f32.xlu1 %v444_v32 }
 0x142   : > { %v390_v33 = vpop.xlane.xlu2 %389  ;;  %v382_v34 = vpop.xlane.xlu0 %381 }
 0x143   : > { %v413_v35 = vmul.f32 0.0078125, %v382_v34  ;;  %v1513_v39 = vmul.f32 0.0078125, %v390_v33  ;;  %v1539_v34 = vld [vmem:[%s1794_s4] ss:$0 sm:$0xff] }
 0x144   : > { %v446_v36 = vpop.xlane.xlu1 %445 }
 0x145   : > { %v493_v40 = vmul.f32 %v413_v35, %v413_v35  ;;  %v477_v41 = vmul.f32 0.0078125, %v446_v36  ;;  %v497_v43 = vmul.f32 %v1513_v39, %v1513_v39 }
 0x147   : > { %v509_v42 = vsub.f32 %v477_v41, %v493_v40 }
 0x149   : > { %v525_v44 = vmax.f32 %v509_v42, 0.0 }
 0x14a   : > { %v454_v46 = vpop.xlane.xlu2 %453  ;;  %v406_v47 = vpop.xlane.xlu0 %405 }
 0x14b   : > { %v541_v48 = vadd.f32 1e-05, %v525_v44  ;;  %v481_v49 = vmul.f32 0.0078125, %v454_v46  ;;  %v1517_v52 = vmul.f32 0.0078125, %v406_v47 }
 0x14c   : > { %v470_v53 = vpop.xlane.xlu1 %469 }
 0x14d   : > { %1050 = vrsqrt.f32 %v541_v48  ;;  %v513_v55 = vsub.f32 %v481_v49, %v497_v43  ;;  %v505_v56 = vmul.f32 %v1517_v52, %v1517_v52  ;;  %v489_v57 = vmul.f32 0.0078125, %v470_v53 }
 0x14e   : > { %vm563_vm1 = vweird.f32 %v541_v48 }
 0x14f   : > { %v529_v58 = vmax.f32 %v513_v55, 0.0  ;;  %v521_v60 = vsub.f32 %v489_v57, %v505_v56 }
 0x151   : > { %v545_v62 = vadd.f32 1e-05, %v529_v58  ;;  %v537_v0 = vmax.f32 %v521_v60, 0.0 }
 0x152   : > { %v398_v1 = vpop.xlane.xlu2 %397  ;;  %v384_v2 = vpop.xlane.xlu0 %383 }
 0x153   : > { %v1051_v3 = vpop.eup %1050  ;;  %1052 = vrsqrt.f32 %v545_v62  ;;  %v553_v5 = vadd.f32 1e-05, %v537_v0  ;;  %v1523_v7 = vmul.f32 0.0078125, %v398_v1  ;;  %v1542_v43 = vmul.f32 0.0078125, %v384_v2 }
 0x154   : > { %v558_v4 = vmul.f32 %v1051_v3, %v541_v48  ;;  %v1521_v6 = vpop.xlane.xlu1 %407  ;;  %vm564_vm0 = vweird.f32 %v1051_v3  ;;  %vm603_vm4 = vweird.f32 %v545_v62 }
 0x155   : > { %1054 = vrsqrt.f32 %v553_v5  ;;  %v501_v14 = vmul.f32 %v1523_v7, %v1523_v7  ;;  %vm565_vm2 = vmor %vm563_vm1, %vm564_vm0  ;;  %v494_v60 = vmul.f32 %v1542_v43, %v1542_v43  ;;  %vm683_vm7 = vweird.f32 %v553_v5 }
 0x156   : > { %v559_v10 = vmul.f32 %v1051_v3, %v558_v4 }
 0x158   : > { %v560_v11 = vmul.f32 0.5, %v559_v10 }
 0x159   : > { %v1053_v13 = vpop.eup %1052 }
 0x15a   : > { %v561_v15 = vsub.f32 1.5, %v560_v11  ;;  %v598_v16 = vmul.f32 %v1053_v13, %v545_v62  ;;  %v392_v18 = vpop.xlane.xlu2 %391  ;;  %v462_v19 = vpop.xlane.xlu0 %461  ;;  %vm604_vm3 = vweird.f32 %v1053_v13 }
 0x15b   : > { %v485_v21 = vmul.f32 0.0078125, %v462_v19  ;;  %v1055_v23 = vpop.eup %1054  ;;  %v1534_v33 = vmul.f32 0.0078125, %v392_v18  ;;  %vm605_vm6 = vmor %vm603_vm4, %vm604_vm3 }
 0x15c   : > { %v562_v24 = vmul.f32 %v1051_v3, %v561_v15  ;;  %v599_v25 = vmul.f32 %v1053_v13, %v598_v16  ;;  %v1532_v28 = vpop.xlane.xlu1 %385  ;;  %v678_v29 = vmul.f32 %v1055_v23, %v553_v5  ;;  %vm684_vm5 = vweird.f32 %v1055_v23 }
 0x15d   : > { %v517_v30 = vsub.f32 %v485_v21, %v501_v14  ;;  %v498_v49 = vmul.f32 %v1534_v33, %v1534_v33  ;;  %vm685_vm8 = vmor %vm683_vm7, %vm684_vm5 }
 0x15e   : > { %v566_v31 = vsel %vm565_vm2, %v1051_v3, %v562_v24  ;;  %v600_v32 = vmul.f32 0.5, %v599_v25  ;;  %v679_v40 = vmul.f32 %v1055_v23, %v678_v29 }
 0x15f   : > { %v721_v36 = vmul.f32 %v1530_v20, %v566_v31  ;;  %v533_v41 = vmax.f32 %v517_v30, 0.0 }
 0x160   : > { %v601_v42 = vsub.f32 1.5, %v600_v32  ;;  %v680_v46 = vmul.f32 0.5, %v679_v40 }
 0x161   : > { %v738_v44 = vmul.f32 %v721_v36, %v413_v35  ;;  %v1544_v47 = vadd.f32 1e-05, %v533_v41  ;;  %v773_v57 = vmul.f32 %v721_v36, %v1411_v37 }
 0x162   : > { %v602_v48 = vmul.f32 %v1053_v13, %v601_v42  ;;  %v448_v53 = vpop.xlane.xlu2 %447  ;;  %v456_v55 = vpop.xlane.xlu0 %455  ;;  %v681_v58 = vsub.f32 1.5, %v680_v46 }
 0x163   : > { %v757_v56 = vsub.f32 %v1539_v34, %v738_v44  ;;  %1056 = vrsqrt.f32 %v1544_v47  ;;  %v478_v62 = vmul.f32 0.0078125, %v448_v53  ;;  %v482_v0 = vmul.f32 0.0078125, %v456_v55 }
 0x164   : > { %v606_v35 = vsel %vm605_vm6, %v1053_v13, %v602_v48  ;;  %v464_v1 = vpop.xlane.xlu1 %463  ;;  %v682_v4 = vmul.f32 %v1055_v23, %v681_v58  ;;  %vm643_vm10 = vweird.f32 %v1544_v47 }
 0x165   : > { %v789_v2 = vadd.f32 %v773_v57, %v757_v56  ;;  %v725_v3 = vmul.f32 %v1530_v20, %v606_v35  ;;  %v510_v37 = vsub.f32 %v478_v62, %v494_v60  ;;  %v514_v10 = vsub.f32 %v482_v0, %v498_v49 }
 0x166   : > { %v686_v13 = vsel %vm685_vm8, %v1055_v23, %v682_v4  ;;  %v1586_v60 = vmul.f32 0.0078125, %v1532_v28 }
 0x167   : > { %805 = vst [vmem:[%s1557_s10] sm:$0xff] %v789_v2  ;;  %v742_v11 = vmul.f32 %v725_v3, %v1513_v39  ;;  %v733_v14 = vmul.f32 %v1530_v20, %v686_v13  ;;  %v526_v15 = vmax.f32 %v510_v37, 0.0  ;;  %v530_v16 = vmax.f32 %v514_v10, 0.0 }
 0x168   : > { %v777_v19 = vmul.f32 %v725_v3, %v1413_v38 }
 0x169   : > { %v1057_v18 = vpop.eup %1056  ;;  %v761_v5 = vsub.f32 %v1539_v34, %v742_v11  ;;  %v750_v21 = vmul.f32 %v733_v14, %v1517_v52  ;;  %v1568_v23 = vadd.f32 1e-05, %v526_v15  ;;  %v1570_v30 = vadd.f32 1e-05, %v530_v16 }
 0x16a   : > { %v638_v24 = vmul.f32 %v1057_v18, %v1544_v47  ;;  %v1566_v25 = vpop.xlane.xlu2 %409  ;;  %v400_v29 = vpop.xlane.xlu0 %399  ;;  %v785_v32 = vmul.f32 %v733_v14, %v1422_v45  ;;  %v486_v52 = vmul.f32 0.0078125, %v464_v1  ;;  %vm644_vm9 = vweird.f32 %v1057_v18 }
 0x16b   : > { %v793_v39 = vadd.f32 %v777_v19, %v761_v5  ;;  %v769_v31 = vsub.f32 %v1539_v34, %v750_v21  ;;  %v1574_v40 = vmul.f32 0.0078125, %v400_v29  ;;  %1058 = vrsqrt.f32 %v1568_v23  ;;  %vm645_vm11 = vmor %vm643_vm10, %vm644_vm9 }
 0x16c   : > { %v639_v36 = vmul.f32 %v1057_v18, %v638_v24  ;;  %v458_v38 = vpop.xlane.xlu1 %457  ;;  %1060 = vrsqrt.f32 %v1570_v30  ;;  %v1600_v15 = vmul.f32 0.0078125, %v1521_v6  ;;  %v495_v29 = vmul.f32 %v1586_v60, %v1586_v60 }
 0x16d   : > { %809 = vst [vmem:[%s1557_s10 + $0x20] sm:$0xff] %v793_v39  ;;  %v801_v41 = vadd.f32 %v785_v32, %v769_v31  ;;  %v502_v44 = vmul.f32 %v1574_v40, %v1574_v40  ;;  %v483_v3 = vmul.f32 0.0078125, %v458_v38  ;;  %vm573_vm14 = vweird.f32 %v1568_v23 }
 0x16e   : > { %v640_v42 = vmul.f32 0.5, %v639_v36  ;;  %vm613_vm0 = vweird.f32 %v1570_v30 }
 0x16f   : > { %817 = vst [vmem:[%s1557_s10 + $0x60] sm:$0xff] %v801_v41  ;;  %v518_v48 = vsub.f32 %v486_v52, %v502_v44 }
 0x170   : > { %v641_v46 = vsub.f32 1.5, %v640_v42 }
 0x171   : > { %v534_v49 = vmax.f32 %v518_v48, 0.0  ;;  %v1059_v56 = vpop.eup %1058 }
 0x172   : > { %v642_v45 = vmul.f32 %v1057_v18, %v641_v46  ;;  %v466_v53 = vpop.xlane.xlu2 %465  ;;  %v394_v55 = vpop.xlane.xlu0 %393  ;;  %v568_v62 = vmul.f32 %v1059_v56, %v1568_v23  ;;  %vm574_vm12 = vweird.f32 %v1059_v56 }
 0x173   : > { %v1583_v57 = vmul.f32 0.0078125, %v394_v55  ;;  %v1061_v58 = vpop.eup %1060  ;;  %v1589_v0 = vadd.f32 1e-05, %v534_v49  ;;  %v487_v10 = vmul.f32 0.0078125, %v466_v53  ;;  %vm575_vm15 = vmor %vm573_vm14, %vm574_vm12 }
 0x174   : > { %v646_v35 = vsel %vm645_vm11, %v1057_v18, %v642_v45  ;;  %v402_v1 = vpop.xlane.xlu1 %401  ;;  %v608_v47 = vmul.f32 %v1061_v58, %v1570_v30  ;;  %v569_v37 = vmul.f32 %v1059_v56, %v568_v62  ;;  %vm614_vm13 = vweird.f32 %v1061_v58 }
 0x175   : > { %v729_v2 = vmul.f32 %v1530_v20, %v646_v35  ;;  %v499_v4 = vmul.f32 %v1583_v57, %v1583_v57  ;;  %1062 = vrsqrt.f32 %v1589_v0  ;;  %v1596_v11 = vmul.f32 0.0078125, %v402_v1  ;;  %vm615_vm1 = vmor %vm613_vm0, %vm614_vm13 }
 0x176   : > { %v609_v13 = vmul.f32 %v1061_v58, %v608_v47  ;;  %v570_v16 = vmul.f32 0.5, %v569_v37  ;;  %v1624_v30 = vmul.f32 %v1600_v15, %v1600_v15  ;;  %vm653_vm3 = vweird.f32 %v1589_v0 }
 0x177   : > { %v746_v28 = vmul.f32 %v729_v2, %v1523_v7  ;;  %v515_v14 = vsub.f32 %v483_v3, %v499_v4  ;;  %v503_v18 = vmul.f32 %v1596_v11, %v1596_v11  ;;  %v781_v19 = vmul.f32 %v729_v2, %v1431_v51 }
 0x178   : > { %v610_v21 = vmul.f32 0.5, %v609_v13  ;;  %v571_v7 = vsub.f32 1.5, %v570_v16  ;;  %v1629_v3 = vmul.f32 0.0078125, %v1566_v25 }
 0x179   : > { %v765_v5 = vsub.f32 %v1539_v34, %v746_v28  ;;  %v531_v24 = vmax.f32 %v515_v14, 0.0  ;;  %v519_v39 = vsub.f32 %v487_v10, %v503_v18 }
 0x17a   : > { %v460_v31 = vpop.xlane.xlu2 %459  ;;  %v450_v6 = vpop.xlane.xlu0 %449  ;;  %v611_v36 = vsub.f32 1.5, %v610_v21  ;;  %v572_v41 = vmul.f32 %v1059_v56, %v571_v7 }
 0x17b   : > { %v797_v32 = vadd.f32 %v781_v19, %v765_v5  ;;  %v1608_v38 = vadd.f32 1e-05, %v531_v24  ;;  %v1063_v52 = vpop.eup %1062  ;;  %v535_v51 = vmax.f32 %v519_v39, 0.0  ;;  %v479_v42 = vmul.f32 0.0078125, %v450_v6 }
 0x17c   : > { %v388_v44 = vpop.xlane.xlu1 %387  ;;  %v612_v46 = vmul.f32 %v1061_v58, %v611_v36  ;;  %v648_v48 = vmul.f32 %v1063_v52, %v1589_v0  ;;  %v576_v45 = vsel %vm575_vm15, %v1059_v56, %v572_v41  ;;  %vm654_vm2 = vweird.f32 %v1063_v52 }
 0x17d   : > { %813 = vst [vmem:[%s1557_s10 + $0x40] sm:$0xff] %v797_v32  ;;  %1064 = vrsqrt.f32 %v1608_v38  ;;  %v1617_v49 = vadd.f32 1e-05, %v535_v51  ;;  %v511_v53 = vsub.f32 %v479_v42, %v495_v29  ;;  %v722_v23 = vmul.f32 %v1530_v20, %v576_v45  ;;  %vm655_vm4 = vmor %vm653_vm3, %vm654_vm2 }
 0x17e   : > { %v616_v55 = vsel %vm615_vm1, %v1061_v58, %v612_v46  ;;  %v649_v35 = vmul.f32 %v1063_v52, %v648_v48  ;;  %v1635_v16 = vmul.f32 0.0078125, %v388_v44  ;;  %v484_v7 = vmul.f32 0.0078125, %v460_v31 }
 0x17f   : > { %v726_v62 = vmul.f32 %v1530_v20, %v616_v55  ;;  %1066 = vrsqrt.f32 %v1617_v49  ;;  %v527_v1 = vmax.f32 %v511_v53, 0.0  ;;  %v739_v56 = vmul.f32 %v722_v23, %v1542_v43 }
 0x180   : > { %v650_v2 = vmul.f32 0.5, %v649_v35  ;;  %v774_v13 = vmul.f32 %v722_v23, %v1429_v50  ;;  %vm623_vm5 = vweird.f32 %v1608_v38  ;;  %vm663_vm6 = vweird.f32 %v1617_v49 }
 0x181   : > { %v743_v47 = vmul.f32 %v726_v62, %v1534_v33  ;;  %v1631_v58 = vadd.f32 1e-05, %v527_v1  ;;  %v758_v28 = vsub.f32 %v1539_v34, %v739_v56  ;;  %v778_v33 = vmul.f32 %v726_v62, %v1441_v59 }
 0x182   : > { %v404_v4 = vpop.xlane.xlu2 %403  ;;  %v412_v37 = vpop.xlane.xlu0 %411  ;;  %v651_v14 = vsub.f32 1.5, %v650_v2  ;;  %v496_v36 = vmul.f32 %v1635_v16, %v1635_v16 }
 0x183   : > { %v1065_v10 = vpop.eup %1064  ;;  %v762_v43 = vsub.f32 %v1539_v34, %v743_v47  ;;  %1068 = vrsqrt.f32 %v1631_v58  ;;  %v790_v5 = vadd.f32 %v774_v13, %v758_v28  ;;  %v1642_v21 = vmul.f32 0.0078125, %v404_v4 }
 0x184   : > { %v618_v25 = vmul.f32 %v1065_v10, %v1608_v38  ;;  %v396_v18 = vpop.xlane.xlu1 %395  ;;  %v652_v19 = vmul.f32 %v1063_v52, %v651_v14  ;;  %vm624_vm7 = vweird.f32 %v1065_v10  ;;  %v1659_v51 = vmul.f32 0.0078125, %v412_v37 }
 0x185   : > { %v1067_v50 = vpop.eup %1066  ;;  %v794_v24 = vadd.f32 %v778_v33, %v762_v43  ;;  %v1645_v39 = vmul.f32 0.0078125, %v396_v18  ;;  %806 = vst [vmem:[%s1557_s10 + $0x8] sm:$0xff] %v790_v5  ;;  %vm625_vm9 = vmor %vm623_vm5, %vm624_vm7  ;;  %vm583_vm11 = vweird.f32 %v1631_v58 }
 0x186   : > { %v619_v29 = vmul.f32 %v1065_v10, %v618_v25  ;;  %v656_v59 = vsel %vm655_vm4, %v1063_v52, %v652_v19  ;;  %v658_v6 = vmul.f32 %v1067_v50, %v1617_v49  ;;  %v504_v52 = vmul.f32 %v1642_v21, %v1642_v21 }
 0x187   : > { %810 = vst [vmem:[%s1557_s10 + $0x28] sm:$0xff] %v794_v24  ;;  %v730_v0 = vmul.f32 %v1530_v20, %v656_v59  ;;  %v500_v31 = vmul.f32 %v1645_v39, %v1645_v39  ;;  %vm664_vm8 = vweird.f32 %v1067_v50 }
 0x188   : > { %v620_v32 = vmul.f32 0.5, %v619_v29  ;;  %v659_v41 = vmul.f32 %v1067_v50, %v658_v6  ;;  %vm665_vm10 = vmor %vm663_vm6, %vm664_vm8 }
 0x189   : > { %v1069_v42 = vpop.eup %1068  ;;  %v747_v44 = vmul.f32 %v730_v0, %v1574_v40  ;;  %v516_v48 = vsub.f32 %v484_v7, %v500_v31  ;;  %v782_v23 = vmul.f32 %v730_v0, %v1451_v63 }
 0x18a   : > { %v621_v46 = vsub.f32 1.5, %v620_v32  ;;  %v472_v45 = vpop.xlane.xlu2 %471  ;;  %v468_v53 = vpop.xlane.xlu0 %467  ;;  %v660_v55 = vmul.f32 0.5, %v659_v41  ;;  %v578_v35 = vmul.f32 %v1069_v42, %v1631_v58  ;;  %vm584_vm12 = vweird.f32 %v1069_v42 }
 0x18b   : > { %v490_v62 = vmul.f32 0.0078125, %v472_v45  ;;  %v766_v1 = vsub.f32 %v1539_v34, %v747_v44  ;;  %v532_v2 = vmax.f32 %v516_v48, 0.0  ;;  %v488_v47 = vmul.f32 0.0078125, %v468_v53  ;;  %vm585_vm13 = vmor %vm583_vm11, %vm584_vm12 }
 0x18c   : > { %v622_v56 = vmul.f32 %v1065_v10, %v621_v46  ;;  %v452_v4 = vpop.xlane.xlu1 %451  ;;  %v661_v40 = vsub.f32 1.5, %v660_v55  ;;  %v579_v37 = vmul.f32 %v1069_v42, %v578_v35  ;;  %v508_v58 = vmul.f32 %v1659_v51, %v1659_v51 }
 0x18d   : > { %v522_v28 = vsub.f32 %v490_v62, %v1624_v30  ;;  %v480_v63 = vmul.f32 0.0078125, %v452_v4  ;;  %v798_v13 = vadd.f32 %v782_v23, %v766_v1  ;;  %v1669_v43 = vadd.f32 1e-05, %v532_v2 }
 0x18e   : > { %v626_v14 = vsel %vm625_vm9, %v1065_v10, %v622_v56  ;;  %v520_v33 = vsub.f32 %v488_v47, %v504_v52  ;;  %v662_v18 = vmul.f32 %v1067_v50, %v661_v40  ;;  %v580_v5 = vmul.f32 0.5, %v579_v37 }
 0x18f   : > { %v727_v25 = vmul.f32 %v1530_v20, %v626_v14  ;;  %v538_v19 = vmax.f32 %v522_v28, 0.0  ;;  %814 = vst [vmem:[%s1557_s10 + $0x48] sm:$0xff] %v798_v13  ;;  %1070 = vrsqrt.f32 %v1669_v43  ;;  %v512_v30 = vsub.f32 %v480_v63, %v496_v36 }
 0x190   : > { %v536_v38 = vmax.f32 %v520_v33, 0.0  ;;  %v666_v24 = vsel %vm665_vm10, %v1067_v50, %v662_v18  ;;  %v581_v29 = vsub.f32 1.5, %v580_v5  ;;  %vm633_vm15 = vweird.f32 %v1669_v43 }
 0x191   : > { %v744_v10 = vmul.f32 %v727_v25, %v1583_v57  ;;  %v731_v7 = vmul.f32 %v1530_v20, %v666_v24  ;;  %v1680_v59 = vadd.f32 1e-05, %v538_v19  ;;  %v528_v0 = vmax.f32 %v512_v30, 0.0 }
 0x192   : > { %v1682_v6 = vadd.f32 1e-05, %v536_v38  ;;  %v474_v49 = vpop.xlane.xlu0 %473  ;;  %v779_v31 = vmul.f32 %v727_v25, %v1462_v8  ;;  %v582_v41 = vmul.f32 %v1069_v42, %v581_v29  ;;  %v507_v57 = vmul.f32 %v1629_v3, %v1629_v3 }
 0x193   : > { %v763_v32 = vsub.f32 %v1539_v34, %v744_v10  ;;  %v491_v36 = vmul.f32 0.0078125, %v474_v49  ;;  %v748_v50 = vmul.f32 %v731_v7, %v1596_v11  ;;  %1072 = vrsqrt.f32 %v1680_v59 }
 0x194   : > { %v476_v52 = vpop.xlane.xlu1 %475  ;;  %v783_v46 = vmul.f32 %v731_v7, %v1473_v12  ;;  %v586_v48 = vsel %vm585_vm13, %v1069_v42, %v582_v41  ;;  %1074 = vrsqrt.f32 %v1682_v6  ;;  %v1696_v23 = vadd.f32 1e-05, %v528_v0 }
 0x195   : > { %v795_v44 = vadd.f32 %v779_v31, %v763_v32  ;;  %v1071_v8 = vpop.eup %1070  ;;  %v767_v45 = vsub.f32 %v1539_v34, %v748_v50  ;;  %v723_v53 = vmul.f32 %v1530_v20, %v586_v48  ;;  %v523_v11 = vsub.f32 %v491_v36, %v507_v57 }
 0x196   : > { %v628_v55 = vmul.f32 %v1071_v8, %v1669_v43  ;;  %v492_v35 = vmul.f32 0.0078125, %v476_v52  ;;  %1076 = vrsqrt.f32 %v1696_v23  ;;  %vm634_vm14 = vweird.f32 %v1071_v8 }
 0x197   : > { %811 = vst [vmem:[%s1557_s10 + $0x30] sm:$0xff] %v795_v44  ;;  %v799_v12 = vadd.f32 %v783_v46, %v767_v45  ;;  %v740_v42 = vmul.f32 %v723_v53, %v1586_v60  ;;  %v539_v1 = vmax.f32 %v523_v11, 0.0  ;;  %v775_v4 = vmul.f32 %v723_v53, %v1445_v61  ;;  %vm635_vm0 = vmor %vm633_vm15, %vm634_vm14 }
 0x198   : > { %v629_v62 = vmul.f32 %v1071_v8, %v628_v55  ;;  %v524_v56 = vsub.f32 %v492_v35, %v508_v58  ;;  %vm693_vm3 = vweird.f32 %v1680_v59  ;;  %vm673_vm5 = vweird.f32 %v1682_v6 }
 0x199   : > { %v1073_v2 = vpop.eup %1072  ;;  %815 = vst [vmem:[%s1557_s10 + $0x50] sm:$0xff] %v799_v12  ;;  %v759_v47 = vsub.f32 %v1539_v34, %v740_v42  ;;  %v1708_v63 = vadd.f32 1e-05, %v539_v1  ;;  %vm593_vm8 = vweird.f32 %v1696_v23 }
 0x19a   : > { %v1075_v40 = vpop.eup %1074  ;;  %v630_v37 = vmul.f32 0.5, %v629_v62  ;;  %v688_v28 = vmul.f32 %v1073_v2, %v1680_v59  ;;  %v540_v14 = vmax.f32 %v524_v56, 0.0  ;;  %vm694_vm1 = vweird.f32 %v1073_v2 }
 0x19b   : > { %v791_v13 = vadd.f32 %v775_v4, %v759_v47  ;;  %v668_v60 = vmul.f32 %v1075_v40, %v1682_v6  ;;  %1078 = vrsqrt.f32 %v1708_v63  ;;  %vm674_vm2 = vweird.f32 %v1075_v40  ;;  %vm695_vm4 = vmor %vm693_vm3, %vm694_vm1 }
 0x19c   : > { %v631_v33 = vsub.f32 1.5, %v630_v37  ;;  %v689_v25 = vmul.f32 %v1073_v2, %v688_v28  ;;  %v1077_v18 = vpop.eup %1076  ;;  %v1713_v19 = vadd.f32 1e-05, %v540_v14  ;;  %vm675_vm6 = vmor %vm673_vm5, %vm674_vm2  ;;  %vm703_vm11 = vweird.f32 %v1708_v63 }
 0x19d   : > { %807 = vst [vmem:[%s1557_s10 + $0x10] sm:$0xff] %v791_v13  ;;  %v669_v5 = vmul.f32 %v1075_v40, %v668_v60  ;;  %v588_v30 = vmul.f32 %v1077_v18, %v1696_v23  ;;  %vm594_vm7 = vweird.f32 %v1077_v18 }
 0x19e   : > { %v632_v61 = vmul.f32 %v1071_v8, %v631_v33  ;;  %v690_v38 = vmul.f32 0.5, %v689_v25  ;;  %1080 = vrsqrt.f32 %v1713_v19  ;;  %vm595_vm9 = vmor %vm593_vm8, %vm594_vm7  ;;  %vm713_vm14 = vweird.f32 %v1713_v19 }
 0x19f   : > { %v670_v10 = vmul.f32 0.5, %v669_v5  ;;  %v589_v7 = vmul.f32 %v1077_v18, %v588_v30 }
 0x1a0   : > { %v636_v24 = vsel %vm635_vm0, %v1071_v8, %v632_v61  ;;  %v691_v29 = vsub.f32 1.5, %v690_v38 }
 0x1a1   : > { %v728_v0 = vmul.f32 %v1530_v20, %v636_v24  ;;  %v671_v49 = vsub.f32 1.5, %v670_v10  ;;  %v1079_v32 = vpop.eup %1078  ;;  %v590_v43 = vmul.f32 0.5, %v589_v7 }
 0x1a2   : > { %v692_v31 = vmul.f32 %v1073_v2, %v691_v29  ;;  %v698_v57 = vmul.f32 %v1079_v32, %v1708_v63  ;;  %vm704_vm10 = vweird.f32 %v1079_v32 }
 0x1a3   : > { %v745_v41 = vmul.f32 %v728_v0, %v1645_v39  ;;  %v672_v36 = vmul.f32 %v1075_v40, %v671_v49  ;;  %v780_v50 = vmul.f32 %v728_v0, %v1480_v17  ;;  %v591_v44 = vsub.f32 1.5, %v590_v43  ;;  %vm705_vm12 = vmor %vm703_vm11, %vm704_vm10 }
 0x1a4   : > { %v696_v52 = vsel %vm695_vm4, %v1073_v2, %v692_v31  ;;  %v1081_v46 = vpop.eup %1080  ;;  %v699_v39 = vmul.f32 %v1079_v32, %v698_v57 }
 0x1a5   : > { %v764_v48 = vsub.f32 %v1539_v34, %v745_v41  ;;  %v734_v59 = vmul.f32 %v1530_v20, %v696_v52  ;;  %v676_v8 = vsel %vm675_vm6, %v1075_v40, %v672_v36  ;;  %v592_v53 = vmul.f32 %v1077_v18, %v591_v44 }
 0x1a6   : > { %v732_v45 = vmul.f32 %v1530_v20, %v676_v8  ;;  %v708_v6 = vmul.f32 %v1081_v46, %v1713_v19  ;;  %v700_v58 = vmul.f32 0.5, %v699_v39  ;;  %vm714_vm13 = vweird.f32 %v1081_v46 }
 0x1a7   : > { %v796_v17 = vadd.f32 %v780_v50, %v764_v48  ;;  %v751_v11 = vmul.f32 %v734_v59, %v1600_v15  ;;  %v596_v35 = vsel %vm595_vm9, %v1077_v18, %v592_v53  ;;  %v786_v62 = vmul.f32 %v734_v59, %v1434_v54  ;;  %vm715_vm15 = vmor %vm713_vm14, %vm714_vm13 }
 0x1a8   : > { %v749_v55 = vmul.f32 %v732_v45, %v1642_v21  ;;  %v709_v12 = vmul.f32 %v1081_v46, %v708_v6  ;;  %v724_v23 = vmul.f32 %v1530_v20, %v596_v35  ;;  %v701_v1 = vsub.f32 1.5, %v700_v58 }
 0x1a9   : > { %812 = vst [vmem:[%s1557_s10 + $0x38] sm:$0xff] %v796_v17  ;;  %v770_v42 = vsub.f32 %v1539_v34, %v751_v11  ;;  %v784_v15 = vmul.f32 %v732_v45, %v1495_v26 }
 0x1aa   : > { %v768_v56 = vsub.f32 %v1539_v34, %v749_v55  ;;  %v710_v2 = vmul.f32 0.5, %v709_v12  ;;  %v741_v47 = vmul.f32 %v724_v23, %v1635_v16  ;;  %v702_v4 = vmul.f32 %v1079_v32, %v701_v1 }
 0x1ab   : > { %v802_v21 = vadd.f32 %v786_v62, %v770_v42  ;;  %v776_v28 = vmul.f32 %v724_v23, %v1487_v22 }
 0x1ac   : > { %v800_v40 = vadd.f32 %v784_v15, %v768_v56  ;;  %v711_v54 = vsub.f32 1.5, %v710_v2  ;;  %v760_v37 = vsub.f32 %v1539_v34, %v741_v47  ;;  %v706_v13 = vsel %vm705_vm12, %v1079_v32, %v702_v4 }
 0x1ad   : > { %818 = vst [vmem:[%s1557_s10 + $0x68] sm:$0xff] %v802_v21  ;;  %v735_v26 = vmul.f32 %v1530_v20, %v706_v13 }
 0x1ae   : > { %816 = vst [vmem:[%s1557_s10 + $0x58] sm:$0xff] %v800_v40  ;;  %v712_v16 = vmul.f32 %v1081_v46, %v711_v54  ;;  %v792_v63 = vadd.f32 %v776_v28, %v760_v37 }
 0x1af   : > { %v752_v60 = vmul.f32 %v735_v26, %v1629_v3  ;;  %v787_v25 = vmul.f32 %v735_v26, %v1465_v9 }
 0x1b0   : > { %v716_v14 = vsel %vm715_vm15, %v1081_v46, %v712_v16  ;;  %808 = vst [vmem:[%s1557_s10 + $0x18] sm:$0xff] %v792_v63 }
 0x1b1   : > { %v736_v22 = vmul.f32 %v1530_v20, %v716_v14  ;;  %v771_v33 = vsub.f32 %v1539_v34, %v752_v60 }
 0x1b3   : > { %v753_v18 = vmul.f32 %v736_v22, %v1659_v51  ;;  %v803_v3 = vadd.f32 %v787_v25, %v771_v33  ;;  %v788_v19 = vmul.f32 %v736_v22, %v1498_v27 }
 0x1b5   : > { %v772_v5 = vsub.f32 %v1539_v34, %v753_v18  ;;  %819 = vst [vmem:[%s1557_s10 + $0x70] sm:$0xff] %v803_v3 }
 0x1b7   : > { %v804_v61 = vadd.f32 %v788_v19, %v772_v5 }
 0x1b9   : > { %820 = vst [vmem:[%s1557_s10 + $0x78] sm:$0xff] %v804_v61 }
 0x1ba   : > { %1169 = shalt.err (!%p1166_p10)
}
 0x1bb   : > { %s1217_s28 = smov 128   ;;  %s1218_s6 = smov 8  }
 0x1bc   : > { %992 = dma.vmem_to_hbm [thread:$0]  (%p1318_p3), %s835_s22, 2048, %s837_s14, %s822_s8, %s1217_s28, %s1217_s28, %s1218_s6  }
 0x1bd PF: > { %s851_s10 = sand.u32 1, %s1200_s18   ;;  %p1803_p12 = scmp.ge.s32.totalorder %s1212_s21, 2 }
 0x1be   : > { %s852_s17 = scalar_lea.sflag [#allocation4], %s851_s10 }
 0x1bf   : > { %p1003_p13 = pnand %p1803_p12, %p1284_p6 }
 0x1c1   : > { %p1004_p0 = pneg %p1003_p13 }
 0x1c3   : > { %1195 = dma.done.wait (%p1004_p0), %s852_s17, 2048  }
 0x1c4   : > { %1197 = vsyncadd (%p1004_p0), %s852_s17, 4294965248  ;;  %p19_p5 = scmp.ge.s32.totalorder %s1302_s7, 4   ;;  %s1804_s18 = smov %s1204_s19 }
 0x1c5   : > { %s1805_s19 = smov %s1208_s20  ;;  %s1806_s20 = smov %s1314_s12 }
 0x1c6   : > { %s1807_s21 = smov %s1302_s7  ;;  %21 = sbr.rel (!%p19_p5) target bundleno = 6 (0x6), region = 89 }
 0x1cb   :  { %858 = vsyncpa [#allocation3], 1 }
 0x1cc   :  { %860 = vsyncpa [#allocation3 + $0x1], 1 }
 0x1cd   :  { %861 = vsyncpa [#allocation6], 1 }
 0x1ce   :  { %862 = vsyncpa [#allocation4], 1 }
 0x1cf   :  { %864 = vsyncpa [#allocation4 + $0x1], 1 }

// kernel: tpu_custom_call.1
= control target key start
LH: loop header
LB: loop body
LE: loop exit
PB: predicated region body
PF: predicated region fallthrough
CT: control target
= control target key end

     0   :  { %10 = vsyncpa [#allocation3], 0  ;;  %s1790_s0 = inlined_call_operand.hbm [shape: f32[256,128], index: 0, kind: input, shape index: {}]   ;;  %s1791_s1 = inlined_call_operand.hbm [shape: f32[128,128], index: 1, kind: input, shape index: {}]   ;;  %s1792_s2 = inlined_call_operand.vmem [shape: f32[1,128], index: 2, kind: input, shape index: {}]   ;;  %s1793_s3 = inlined_call_operand.vmem [shape: f32[1,128], index: 3, kind: input, shape index: {}]   ;;  %s1794_s4 = inlined_call_operand.vmem [shape: f32[1,128], index: 4, kind: input, shape index: {}]   ;;  %s1795_s5 = inlined_call_operand.hbm [shape: f32[256,128], index: 5, kind: output, shape index: {}]  }
   0x1   :  { %12 = vsyncpa [#allocation3 + $0x1], 0 }
   0x2   :  { %13 = vsyncpa [#allocation6], 0 }
   0x3   :  { %14 = vsyncpa [#allocation4], 0 }
   0x4   :  { %16 = vsyncpa [#allocation4 + $0x1], 0  ;;  %s1249_s18 = smov 0   ;;  %s1251_s19 = smov 0  }
   0x5   :  { %s1253_s20 = smov 0   ;;  %s1255_s21 = smov 0  }
   0x6 LB: > { %s1270_s22 = sadd.s32 4294967295, %s1212_s21   ;;  %s920_s23 = sadd.s32 4294967294, %s1212_s21   ;;  %s1212_s21 = sphi %s1255_s21, %s1807_s21   ;;  %s1208_s20 = sphi %s1253_s20, %s1806_s20   ;;  %s1204_s19 = sphi %s1251_s19, %s1805_s19   ;;  %s1200_s18 = sphi %s1249_s18, %s1804_s18  }
   0x7   : > { %p42_p0 = scmp.ne.s32.totalorder %s1204_s19, %s1200_s18  ;;  %p43_p1 = scmp.eq.s32.totalorder %s1270_s22, 0 }
   0x8   : > { %p150_p2 = scmp.eq.s32.totalorder %s1270_s22, 1  ;;  %p156_p3 = scmp.eq.s32.totalorder %s920_s23, 1 }
   0x9   : > { %p1279_p4 = por %p43_p1, %p42_p0  ;;  %p921_p5 = scmp.ge.s32.totalorder %s1212_s21, 1 }
   0xa   : > { %p1284_p6 = por %p156_p3, %p42_p0  ;;  %p163_p7 = scmp.lt.s32.totalorder %s1212_s21, 3 }
   0xb   : > { %s174_s28 = sshll.u32 %s1791_s1, 4  ;;  %s1214_s30 = smov [#allocation5]   ;;  %s175_s28 = int_to_ptr.hbm [resolvable:$true] %s174_s28 }
   0xc   : > { %p1292_p8 = pnand %p921_p5, %p163_p7  ;;  %s176_s6 = sshll.u32 %s1214_s30, 4  ;;  %s177_s6 = int_to_ptr.vmem [resolvable:$true] %s176_s6 }
   0xd   : > { %s1302_s7 = sadd.s32 1, %s1212_s21   ;;  %s1796_s8 = smov 128  }
   0xe   : > { %p994_p9 = pneg %p1292_p8  ;;  %s1216_s9 = smov 8  }
   0xf   : > { %s26_s10 = ssub.s32 %s1212_s21, %s1302_s7  ;;  %s29_s11 = sadd.s32 1, %s1208_s20 }
  0x10   : > { %p995_p10 = pnand %p994_p9, %p43_p1  ;;  %p27_p12 = scmp.eq.s32.totalorder %s26_s10, 0 }
  0x11   : > { %p36_p13 = scmp.ne.s32.totalorder %s1208_s20, %s1204_s19  ;;  %p37_p0 = scmp.eq.s32.totalorder %s1212_s21, 0 }
  0x12   : > { %997 = dma.hbm_to_vmem [thread:$0]  (!%p995_p10), %s175_s28, 2048, %s177_s6, [#allocation6], %s1796_s8, %s1796_s8, %s1216_s9  }
  0x13   : > { %s1314_s12 = scalar_select %p27_p12, %s1208_s20, %s29_s11  }
  0x14   : > { %p1318_p3 = por %p150_p2, %p36_p13  ;;  %p1007_p5 = scmp.lt.s32.totalorder %s1212_s21, 2 }
  0x15   : > { %s199_s14 = sand.u32 1, %s1208_s20   ;;  %s936_s15 = sshll.u32 %s1212_s21, 7 }
  0x16   : > { %p38_p7 = por %p37_p0, %p36_p13  ;;  %s924_s16 = sshll.u32 %s199_s14, 7 }
  0x17   : > { %s208_s26 = scalar_lea.hbm %s1790_s0, %s936_s15  ;;  %s203_s28 = scalar_lea.vmem [#allocation2], %s924_s16 }
  0x18   : > { %s209_s27 = sshll.u32 %s208_s26, 4  ;;  %s211_s30 = sshll.u32 %s203_s28, 4  ;;  %s210_s27 = int_to_ptr.hbm [resolvable:$true] %s209_s27  ;;  %s212_s30 = int_to_ptr.vmem [resolvable:$true] %s211_s30 }
  0x19   : > { %p1328_p9 = pnand %p1007_p5, %p38_p7  ;;  %s200_s10 = scalar_lea.sflag [#allocation3], %s199_s14 }
  0x1a   : > { %s1112_s11 = sshra.s32 %s210_s27, 4  ;;  %s1119_s16 = scalar_lea.hbm %s1790_s0, 256  ;;  %s1113_s11 = int_to_ptr.hbm [resolvable:$true] %s1112_s11 }
  0x1b   : > { %s1114_s8 = scalar_lea.hbm %s1113_s11, 128  ;;  %p1116_p10 = pneg %p1328_p9 }
  0x1c   : > { %p1115_p2 = scmp.ne.s32.totalorder %s1113_s11, %s1114_s8  ;;  %p1120_p0 = scmp.lt.s32.totalorder %s1113_s11, %s1790_s0 }
  0x1d   : > { %p1121_p5 = scmp.lt.s32.totalorder %s1119_s16, %s1114_s8 }
  0x1e   : > { %p1117_p12 = pnand %p1116_p10, %p1115_p2 }
  0x1f   : > { %p1122_p7 = por %p1121_p5, %p1120_p0 }
  0x20   : > { %p1118_p13 = pneg %p1117_p12 }
  0x22   : > { %p1123_p11 = pnand %p1122_p7, %p1118_p13 }
  0x24   : > { %1126 = shalt.err (!%p1123_p11)
}
  0x25   : > { %s1802_s14 = smov 128   ;;  %223 = sbr.rel (%p1292_p8) target bundleno = 445 (0x1bd), region = 40 }
  0x26   : > { %1001 = dma.hbm_to_vmem [thread:$0]  (!%p1328_p9), %s210_s27, 2048, %s212_s30, %s200_s10, %s1802_s14, %s1802_s14, %s1216_s9  }
  0x27   : > { %s1348_s28 = sand.u32 (!%p1292_p8), 1, %s1204_s19  }
  0x28   : > { %s928_s8 = sshll.u32 (!%p1292_p8), %s1348_s28, 7  ;;  %s226_s11 = scalar_lea.sflag (!%p1292_p8), [#allocation3], %s1348_s28 }
  0x29   : > { %s1354_s15 = scalar_lea.vmem (!%p1292_p8), [#allocation2], %s928_s8 }
  0x2a   : > { %1187 = dma.done.wait (%p1279_p4), %s226_s11, 2048  }
  0x2b   : > { %1189 = vsyncadd (%p1279_p4), %s226_s11, 4294965248 }
  0x2c   : > { %1191 = dma.done.wait (%p43_p1), [#allocation6], 2048  }
  0x2d   : > { %1193 = vsyncadd (%p43_p1), [#allocation6], 4294965248  ;;  %v295_v0 = vld [vmem:[#allocation5 + $0x78] sm:$0xff]  ;;  %v294_v1 = vld [vmem:[#allocation5 + $0x70] sm:$0xff]  ;;  %s1557_s10 = scalar_lea.vmem [#allocation7], %s928_s8  ;;  %s937_s17 = sshll.u32 %s1270_s22, 7 }
  0x2e   : > { %300 = vmatpush.msra.mxu0 %v295_v0  ;;  %938 = vmatpush.msra.mxu1 %v295_v0  ;;  %v293_v2 = vld [vmem:[#allocation5 + $0x68] sm:$0xff]  ;;  %v292_v3 = vld [vmem:[#allocation5 + $0x60] sm:$0xff]  ;;  %v291_v4 = vld [vmem:[#allocation5 + $0x58] sm:$0xff]  ;;  %s833_s26 = scalar_lea.hbm %s1795_s5, %s937_s17  ;;  %s834_s22 = sshll.u32 %s1557_s10, 4  ;;  %s835_s22 = int_to_ptr.vmem [resolvable:$true] %s834_s22 }
  0x2f   : > { %940 = vmatpush.msra.mxu3 %v295_v0  ;;  %939 = vmatpush.msra.mxu2 %v295_v0  ;;  %v290_v5 = vld [vmem:[#allocation5 + $0x50] sm:$0xff]  ;;  %v289_v6 = vld [vmem:[#allocation5 + $0x48] sm:$0xff]  ;;  %v288_v7 = vld [vmem:[#allocation5 + $0x40] sm:$0xff]  ;;  %s836_s14 = sshll.u32 %s833_s26, 4  ;;  %s822_s8 = scalar_lea.sflag [#allocation4], %s1348_s28  ;;  %s837_s14 = int_to_ptr.hbm [resolvable:$true] %s836_s14 }
  0x30   : > { %301 = vmatpush.msra.mxu0 %v294_v1  ;;  %941 = vmatpush.msra.mxu1 %v294_v1  ;;  %v287_v8 = vld [vmem:[#allocation5 + $0x38] sm:$0xff]  ;;  %v286_v9 = vld [vmem:[#allocation5 + $0x30] sm:$0xff]  ;;  %v285_v10 = vld [vmem:[#allocation5 + $0x28] sm:$0xff]  ;;  %s1156_s11 = sshra.s32 %s837_s14, 4  ;;  %s1162_s9 = scalar_lea.hbm %s1795_s5, 256  ;;  %s1157_s11 = int_to_ptr.hbm [resolvable:$true] %s1156_s11 }
  0x31   : > { %943 = vmatpush.msra.mxu3 %v294_v1  ;;  %942 = vmatpush.msra.mxu2 %v294_v1  ;;  %v284_v11 = vld [vmem:[#allocation5 + $0x20] sm:$0xff]  ;;  %v283_v12 = vld [vmem:[#allocation5 + $0x18] sm:$0xff]  ;;  %v282_v13 = vld [vmem:[#allocation5 + $0x10] sm:$0xff]  ;;  %p1163_p11 = scmp.lt.s32.totalorder %s1157_s11, %s1795_s5 }
  0x32   : > { %302 = vmatpush.msra.mxu0 %v293_v2  ;;  %944 = vmatpush.msra.mxu1 %v293_v2  ;;  %v281_v14 = vld [vmem:[#allocation5 + $0x8] sm:$0xff]  ;;  %v280_v15 = vld [vmem:[#allocation5] sm:$0xff]  ;;  %v266_v24 = vld [vmem:[%s1354_s15 + $0x10] sm:$0xff] }
  0x33   : > { %946 = vmatpush.msra.mxu3 %v293_v2  ;;  %945 = vmatpush.msra.mxu2 %v293_v2  ;;  %v264_v16 = vld [vmem:[%s1354_s15] sm:$0xff]  ;;  %v265_v20 = vld [vmem:[%s1354_s15 + $0x8] sm:$0xff]  ;;  %v1377_v25 = vld [vmem:[%s1354_s15 + $0x30] sm:$0xff] }
  0x34   : > { %303 = vmatpush.msra.mxu0 %v292_v3  ;;  %947 = vmatpush.msra.mxu1 %v292_v3  ;;  %v268_v17 = vld [vmem:[%s1354_s15 + $0x20] sm:$0xff]  ;;  %v269_v21 = vld [vmem:[%s1354_s15 + $0x28] sm:$0xff]  ;;  %v1380_v26 = vld [vmem:[%s1354_s15 + $0x70] sm:$0xff] }
  0x35   : > { %949 = vmatpush.msra.mxu3 %v292_v3  ;;  %948 = vmatpush.msra.mxu2 %v292_v3  ;;  %v276_v18 = vld [vmem:[%s1354_s15 + $0x60] sm:$0xff]  ;;  %v277_v22 = vld [vmem:[%s1354_s15 + $0x68] sm:$0xff]  ;;  %v1383_v27 = vld [vmem:[%s1354_s15 + $0x50] sm:$0xff] }
  0x36   : > { %304 = vmatpush.msra.mxu0 %v291_v4  ;;  %950 = vmatpush.msra.mxu1 %v291_v4  ;;  %v272_v19 = vld [vmem:[%s1354_s15 + $0x40] sm:$0xff]  ;;  %v1372_v23 = vld [vmem:[%s1354_s15 + $0x48] sm:$0xff]  ;;  %v1389_v28 = vld [vmem:[%s1354_s15 + $0x38] sm:$0xff] }
  0x37   : > { %952 = vmatpush.msra.mxu3 %v291_v4  ;;  %951 = vmatpush.msra.mxu2 %v291_v4  ;;  %v1392_v29 = vld [vmem:[%s1354_s15 + $0x18] sm:$0xff]  ;;  %v1407_v32 = vld [vmem:[%s1792_s2] ss:$0 sm:$0xff] }
  0x38   : > { %305 = vmatpush.msra.mxu0 %v290_v5  ;;  %953 = vmatpush.msra.mxu1 %v290_v5  ;;  %v1395_v30 = vld [vmem:[%s1354_s15 + $0x58] sm:$0xff] }
  0x39   : > { %955 = vmatpush.msra.mxu3 %v290_v5  ;;  %954 = vmatpush.msra.mxu2 %v290_v5  ;;  %v1398_v31 = vld [vmem:[%s1354_s15 + $0x78] sm:$0xff]  ;;  %s1158_s15 = scalar_lea.hbm %s1157_s11, 128 }
  0x3a   : > { %306 = vmatpush.msra.mxu0 %v289_v6  ;;  %956 = vmatpush.msra.mxu1 %v289_v6  ;;  %p1159_p1 = scmp.ne.s32.totalorder %s1157_s11, %s1158_s15  ;;  %p1164_p9 = scmp.lt.s32.totalorder %s1162_s9, %s1158_s15 }
  0x3b   : > { %958 = vmatpush.msra.mxu3 %v289_v6  ;;  %957 = vmatpush.msra.mxu2 %v289_v6 }
  0x3c   : > { %307 = vmatpush.msra.mxu0 %v288_v7  ;;  %959 = vmatpush.msra.mxu1 %v288_v7  ;;  %p1160_p4 = pnand %p1159_p1, %p1318_p3  ;;  %p1165_p2 = por %p1164_p9, %p1163_p11 }
  0x3d   : > { %961 = vmatpush.msra.mxu3 %v288_v7  ;;  %960 = vmatpush.msra.mxu2 %v288_v7 }
  0x3e   : > { %308 = vmatpush.msra.mxu0 %v287_v8  ;;  %962 = vmatpush.msra.mxu1 %v287_v8  ;;  %p1161_p8 = pneg %p1160_p4 }
  0x3f   : > { %964 = vmatpush.msra.mxu3 %v287_v8  ;;  %963 = vmatpush.msra.mxu2 %v287_v8 }
  0x40   : > { %309 = vmatpush.msra.mxu0 %v286_v9  ;;  %965 = vmatpush.msra.mxu1 %v286_v9  ;;  %p1166_p10 = pnand %p1165_p2, %p1161_p8 }
  0x41   : > { %967 = vmatpush.msra.mxu3 %v286_v9  ;;  %966 = vmatpush.msra.mxu2 %v286_v9 }
  0x42   : > { %310 = vmatpush.msra.mxu0 %v285_v10  ;;  %968 = vmatpush.msra.mxu1 %v285_v10 }
  0x43   : > { %970 = vmatpush.msra.mxu3 %v285_v10  ;;  %969 = vmatpush.msra.mxu2 %v285_v10 }
  0x44   : > { %311 = vmatpush.msra.mxu0 %v284_v11  ;;  %971 = vmatpush.msra.mxu1 %v284_v11 }
  0x45   : > { %973 = vmatpush.msra.mxu3 %v284_v11  ;;  %972 = vmatpush.msra.mxu2 %v284_v11 }
  0x46   : > { %312 = vmatpush.msra.mxu0 %v283_v12  ;;  %974 = vmatpush.msra.mxu1 %v283_v12 }
  0x47   : > { %976 = vmatpush.msra.mxu3 %v283_v12  ;;  %975 = vmatpush.msra.mxu2 %v283_v12 }
  0x48   : > { %313 = vmatpush.msra.mxu0 %v282_v13  ;;  %977 = vmatpush.msra.mxu1 %v282_v13 }
  0x49   : > { %979 = vmatpush.msra.mxu3 %v282_v13  ;;  %978 = vmatpush.msra.mxu2 %v282_v13 }
  0x4a   : > { %314 = vmatpush.msra.mxu0 %v281_v14  ;;  %980 = vmatpush.msra.mxu1 %v281_v14 }
  0x4b   : > { %982 = vmatpush.msra.mxu3 %v281_v14  ;;  %981 = vmatpush.msra.mxu2 %v281_v14 }
  0x4c   : > { %315 = vmatpush.msra.mxu0 %v280_v15  ;;  %983 = vmatpush.msra.mxu1 %v280_v15 }
  0x4d   : > { %316 = vmatmul.f32.vlgmr.msra.gmra.mxu0 %v264_v16  ;;  %328 = vmatmul.f32.vlgmr.msra.gmra.mxu1 %v268_v17 }
  0x4e   : > { %985 = vmatpush.msra.mxu3 %v280_v15  ;;  %984 = vmatpush.msra.mxu2 %v280_v15 }
  0x4f   : > { %352 = vmatmul.f32.vlgmr.msra.gmra.mxu3 %v276_v18  ;;  %340 = vmatmul.f32.vlgmr.msra.gmra.mxu2 %v272_v19 }
  0x55   : > { %319 = vmatmul.f32.gmra.mxu0 %v265_v20  ;;  %331 = vmatmul.f32.gmra.mxu1 %v269_v21 }
  0x57   : > { %355 = vmatmul.f32.gmra.mxu3 %v277_v22  ;;  %343 = vmatmul.f32.gmra.mxu2 %v1372_v23 }
  0x5d   : > { %322 = vmatmul.f32.gmra.mxu0 %v266_v24  ;;  %334 = vmatmul.f32.gmra.mxu1 %v1377_v25 }
  0x5f   : > { %358 = vmatmul.f32.gmra.mxu3 %v1380_v26  ;;  %346 = vmatmul.f32.gmra.mxu2 %v1383_v27 }
  0x65   : > { %337 = vmatmul.f32.gmra.mxu1 %v1389_v28  ;;  %325 = vmatmul.f32.gmra.mxu0 %v1392_v29 }
  0x67   : > { %349 = vmatmul.f32.gmra.mxu2 %v1395_v30  ;;  %361 = vmatmul.f32.gmra.mxu3 %v1398_v31 }
  0xca   : > { %v317_v33 = vpop.f32.mrf.mxu0  ;;  %v329_v34 = vpop.f32.mrf.mxu1 }
  0xcb   : > { %v318_v35 = vadd.f32 %v1407_v32, %v317_v33  ;;  %v330_v36 = vadd.f32 %v1407_v32, %v329_v34 }
  0xcd   : > { %v1411_v37 = vadd.f32 %v318_v35, %v264_v16  ;;  %v1413_v38 = vadd.f32 %v330_v36, %v268_v17 }
  0xcf   : > { %389 = vadd.xlane.f32.xlu2 %v1413_v38  ;;  %381 = vadd.xlane.f32.xlu0 %v1411_v37  ;;  %v429_v39 = vmul.f32 %v1411_v37, %v1411_v37  ;;  %v433_v42 = vmul.f32 %v1413_v38, %v1413_v38 }
  0xd1   : > { %445 = vadd.xlane.f32.xlu1 %v429_v39 }
  0xd2   : > { %v353_v40 = vpop.f32.mrf.mxu3  ;;  %v320_v43 = vpop.f32.mrf.mxu0 }
  0xd3   : > { %v354_v41 = vadd.f32 %v1407_v32, %v353_v40  ;;  %v341_v44 = vpop.f32.mrf.mxu2  ;;  %v321_v47 = vadd.f32 %v1407_v32, %v320_v43  ;;  %v332_v53 = vpop.f32.mrf.mxu1 }
  0xd4   : > { %v342_v48 = vadd.f32 %v1407_v32, %v341_v44  ;;  %v333_v56 = vadd.f32 %v1407_v32, %v332_v53 }
  0xd5   : > { %v1422_v45 = vadd.f32 %v354_v41, %v276_v18  ;;  %v1429_v50 = vadd.f32 %v321_v47, %v265_v20 }
  0xd6   : > { %v1431_v51 = vadd.f32 %v342_v48, %v272_v19  ;;  %v1441_v59 = vadd.f32 %v333_v56, %v269_v21 }
  0xd7   : > { %453 = vadd.xlane.f32.xlu2 %v433_v42  ;;  %405 = vadd.xlane.f32.xlu0 %v1422_v45  ;;  %v441_v46 = vmul.f32 %v1422_v45, %v1422_v45  ;;  %v430_v3 = vmul.f32 %v1429_v50, %v1429_v50 }
  0xd8   : > { %v437_v60 = vmul.f32 %v1431_v51, %v1431_v51  ;;  %v434_v1 = vmul.f32 %v1441_v59, %v1441_v59 }
  0xd9   : > { %469 = vadd.xlane.f32.xlu1 %v441_v46 }
  0xda   : > { %v356_v49 = vpop.f32.mrf.mxu3  ;;  %v323_v55 = vpop.f32.mrf.mxu0 }
  0xdb   : > { %v357_v52 = vadd.f32 %v1407_v32, %v356_v49  ;;  %v324_v57 = vadd.f32 %v1407_v32, %v323_v55  ;;  %v344_v58 = vpop.f32.mrf.mxu2  ;;  %v335_v0 = vpop.f32.mrf.mxu1 }
  0xdc   : > { %v345_v62 = vadd.f32 %v1407_v32, %v344_v58  ;;  %v336_v5 = vadd.f32 %v1407_v32, %v335_v0 }
  0xdd   : > { %v1434_v54 = vadd.f32 %v357_v52, %v277_v22  ;;  %v1445_v61 = vadd.f32 %v324_v57, %v266_v24 }
  0xde   : > { %v1451_v63 = vadd.f32 %v345_v62, %v1372_v23  ;;  %v1462_v8 = vadd.f32 %v336_v5, %v1377_v25 }
  0xdf   : > { %397 = vadd.xlane.f32.xlu2 %v1431_v51  ;;  %383 = vadd.xlane.f32.xlu0 %v1429_v50  ;;  %v431_v23 = vmul.f32 %v1445_v61, %v1445_v61 }
  0xe0   : > { %v438_v4 = vmul.f32 %v1451_v63, %v1451_v63  ;;  %v435_v11 = vmul.f32 %v1462_v8, %v1462_v8 }
  0xe1   : > { %407 = vadd.xlane.f32.xlu1 %v1434_v54 }
  0xe2   : > { %v359_v2 = vpop.f32.mrf.mxu3  ;;  %v326_v16 = vpop.f32.mrf.mxu0 }
  0xe3   : > { %v360_v6 = vadd.f32 %v1407_v32, %v359_v2  ;;  %v347_v7 = vpop.f32.mrf.mxu2  ;;  %v338_v13 = vpop.f32.mrf.mxu1  ;;  %v327_v18 = vadd.f32 %v1407_v32, %v326_v16 }
  0xe4   : > { %v348_v10 = vadd.f32 %v1407_v32, %v347_v7  ;;  %v339_v15 = vadd.f32 %v1407_v32, %v338_v13 }
  0xe5   : > { %v1465_v9 = vadd.f32 %v360_v6, %v1380_v26  ;;  %v1487_v22 = vadd.f32 %v327_v18, %v1392_v29  ;;  %v442_v29 = vmul.f32 %v1434_v54, %v1434_v54 }
  0xe6   : > { %v1473_v12 = vadd.f32 %v348_v10, %v1383_v27  ;;  %v1480_v17 = vadd.f32 %v339_v15, %v1389_v28 }
  0xe7   : > { %391 = vadd.xlane.f32.xlu2 %v1441_v59  ;;  %461 = vadd.xlane.f32.xlu0 %v437_v60 }
  0xe8   : > { %v439_v14 = vmul.f32 %v1473_v12, %v1473_v12  ;;  %v436_v19 = vmul.f32 %v1480_v17, %v1480_v17 }
  0xe9   : > { %385 = vadd.xlane.f32.xlu1 %v1445_v61 }
  0xea   : > { %v362_v21 = vpop.f32.mrf.mxu3 }
  0xeb   : > { %v350_v20 = vpop.f32.mrf.mxu2  ;;  %v363_v25 = vadd.f32 %v1407_v32, %v362_v21 }
  0xec   : > { %v351_v24 = vadd.f32 %v1407_v32, %v350_v20  ;;  %v1530_v20 = vld [vmem:[%s1793_s3] ss:$0 sm:$0xff] }
  0xed   : > { %v1498_v27 = vadd.f32 %v363_v25, %v1398_v31  ;;  %v443_v31 = vmul.f32 %v1465_v9, %v1465_v9 }
  0xee   : > { %v1495_v26 = vadd.f32 %v351_v24, %v1395_v30  ;;  %v432_v30 = vmul.f32 %v1487_v22, %v1487_v22 }
  0xef   : > { %447 = vadd.xlane.f32.xlu2 %v430_v3  ;;  %455 = vadd.xlane.f32.xlu0 %v434_v1  ;;  %v444_v32 = vmul.f32 %v1498_v27, %v1498_v27 }
  0xf0   : > { %v440_v28 = vmul.f32 %v1495_v26, %v1495_v26 }
  0xf1   : > { %463 = vadd.xlane.f32.xlu1 %v438_v4 }
  0xf7   : > { %409 = vadd.xlane.f32.xlu2 %v1465_v9  ;;  %399 = vadd.xlane.f32.xlu0 %v1451_v63 }
  0xf9   : > { %457 = vadd.xlane.f32.xlu1 %v435_v11 }
  0xff   : > { %465 = vadd.xlane.f32.xlu2 %v439_v14  ;;  %393 = vadd.xlane.f32.xlu0 %v1462_v8 }
 0x101   : > { %401 = vadd.xlane.f32.xlu1 %v1473_v12 }
 0x107   : > { %459 = vadd.xlane.f32.xlu2 %v436_v19  ;;  %449 = vadd.xlane.f32.xlu0 %v431_v23 }
 0x109   : > { %387 = vadd.xlane.f32.xlu1 %v1487_v22 }
 0x10f   : > { %403 = vadd.xlane.f32.xlu2 %v1495_v26  ;;  %411 = vadd.xlane.f32.xlu0 %v1498_v27 }
 0x111   : > { %395 = vadd.xlane.f32.xlu1 %v1480_v17 }
 0x117   : > { %471 = vadd.xlane.f32.xlu2 %v442_v29  ;;  %467 = vadd.xlane.f32.xlu0 %v440_v28 }
 0x119   : > { %451 = vadd.xlane.f32.xlu1 %v432_v30 }
 0x11f   : > { %473 = vadd.xlane.f32.xlu0 %v443_v31 }
 0x121   : > { %475 = vadd.xlane.f32.xlu1 %v444_v32 }
 0x142   : > { %v390_v33 = vpop.xlane.xlu2 %389  ;;  %v382_v34 = vpop.xlane.xlu0 %381 }
 0x143   : > { %v413_v35 = vmul.f32 0.0078125, %v382_v34  ;;  %v1513_v39 = vmul.f32 0.0078125, %v390_v33  ;;  %v1539_v34 = vld [vmem:[%s1794_s4] ss:$0 sm:$0xff] }
 0x144   : > { %v446_v36 = vpop.xlane.xlu1 %445 }
 0x145   : > { %v493_v40 = vmul.f32 %v413_v35, %v413_v35  ;;  %v477_v41 = vmul.f32 0.0078125, %v446_v36  ;;  %v497_v43 = vmul.f32 %v1513_v39, %v1513_v39 }
 0x147   : > { %v509_v42 = vsub.f32 %v477_v41, %v493_v40 }
 0x149   : > { %v525_v44 = vmax.f32 %v509_v42, 0.0 }
 0x14a   : > { %v454_v46 = vpop.xlane.xlu2 %453  ;;  %v406_v47 = vpop.xlane.xlu0 %405 }
 0x14b   : > { %v541_v48 = vadd.f32 1e-05, %v525_v44  ;;  %v481_v49 = vmul.f32 0.0078125, %v454_v46  ;;  %v1517_v52 = vmul.f32 0.0078125, %v406_v47 }
 0x14c   : > { %v470_v53 = vpop.xlane.xlu1 %469 }
 0x14d   : > { %1050 = vrsqrt.f32 %v541_v48  ;;  %v513_v55 = vsub.f32 %v481_v49, %v497_v43  ;;  %v505_v56 = vmul.f32 %v1517_v52, %v1517_v52  ;;  %v489_v57 = vmul.f32 0.0078125, %v470_v53 }
 0x14e   : > { %vm563_vm1 = vweird.f32 %v541_v48 }
 0x14f   : > { %v529_v58 = vmax.f32 %v513_v55, 0.0  ;;  %v521_v60 = vsub.f32 %v489_v57, %v505_v56 }
 0x151   : > { %v545_v62 = vadd.f32 1e-05, %v529_v58  ;;  %v537_v0 = vmax.f32 %v521_v60, 0.0 }
 0x152   : > { %v398_v1 = vpop.xlane.xlu2 %397  ;;  %v384_v2 = vpop.xlane.xlu0 %383 }
 0x153   : > { %v1051_v3 = vpop.eup %1050  ;;  %1052 = vrsqrt.f32 %v545_v62  ;;  %v553_v5 = vadd.f32 1e-05, %v537_v0  ;;  %v1523_v7 = vmul.f32 0.0078125, %v398_v1  ;;  %v1542_v43 = vmul.f32 0.0078125, %v384_v2 }
 0x154   : > { %v558_v4 = vmul.f32 %v1051_v3, %v541_v48  ;;  %v1521_v6 = vpop.xlane.xlu1 %407  ;;  %vm564_vm0 = vweird.f32 %v1051_v3  ;;  %vm603_vm4 = vweird.f32 %v545_v62 }
 0x155   : > { %1054 = vrsqrt.f32 %v553_v5  ;;  %v501_v14 = vmul.f32 %v1523_v7, %v1523_v7  ;;  %vm565_vm2 = vmor %vm563_vm1, %vm564_vm0  ;;  %v494_v60 = vmul.f32 %v1542_v43, %v1542_v43  ;;  %vm683_vm7 = vweird.f32 %v553_v5 }
 0x156   : > { %v559_v10 = vmul.f32 %v1051_v3, %v558_v4 }
 0x158   : > { %v560_v11 = vmul.f32 0.5, %v559_v10 }
 0x159   : > { %v1053_v13 = vpop.eup %1052 }
 0x15a   : > { %v561_v15 = vsub.f32 1.5, %v560_v11  ;;  %v598_v16 = vmul.f32 %v1053_v13, %v545_v62  ;;  %v392_v18 = vpop.xlane.xlu2 %391  ;;  %v462_v19 = vpop.xlane.xlu0 %461  ;;  %vm604_vm3 = vweird.f32 %v1053_v13 }
 0x15b   : > { %v485_v21 = vmul.f32 0.0078125, %v462_v19  ;;  %v1055_v23 = vpop.eup %1054  ;;  %v1534_v33 = vmul.f32 0.0078125, %v392_v18  ;;  %vm605_vm6 = vmor %vm603_vm4, %vm604_vm3 }
 0x15c   : > { %v562_v24 = vmul.f32 %v1051_v3, %v561_v15  ;;  %v599_v25 = vmul.f32 %v1053_v13, %v598_v16  ;;  %v1532_v28 = vpop.xlane.xlu1 %385  ;;  %v678_v29 = vmul.f32 %v1055_v23, %v553_v5  ;;  %vm684_vm5 = vweird.f32 %v1055_v23 }
 0x15d   : > { %v517_v30 = vsub.f32 %v485_v21, %v501_v14  ;;  %v498_v49 = vmul.f32 %v1534_v33, %v1534_v33  ;;  %vm685_vm8 = vmor %vm683_vm7, %vm684_vm5 }
 0x15e   : > { %v566_v31 = vsel %vm565_vm2, %v1051_v3, %v562_v24  ;;  %v600_v32 = vmul.f32 0.5, %v599_v25  ;;  %v679_v40 = vmul.f32 %v1055_v23, %v678_v29 }
 0x15f   : > { %v721_v36 = vmul.f32 %v1530_v20, %v566_v31  ;;  %v533_v41 = vmax.f32 %v517_v30, 0.0 }
 0x160   : > { %v601_v42 = vsub.f32 1.5, %v600_v32  ;;  %v680_v46 = vmul.f32 0.5, %v679_v40 }
 0x161   : > { %v738_v44 = vmul.f32 %v721_v36, %v413_v35  ;;  %v1544_v47 = vadd.f32 1e-05, %v533_v41  ;;  %v773_v57 = vmul.f32 %v721_v36, %v1411_v37 }
 0x162   : > { %v602_v48 = vmul.f32 %v1053_v13, %v601_v42  ;;  %v448_v53 = vpop.xlane.xlu2 %447  ;;  %v456_v55 = vpop.xlane.xlu0 %455  ;;  %v681_v58 = vsub.f32 1.5, %v680_v46 }
 0x163   : > { %v757_v56 = vsub.f32 %v1539_v34, %v738_v44  ;;  %1056 = vrsqrt.f32 %v1544_v47  ;;  %v478_v62 = vmul.f32 0.0078125, %v448_v53  ;;  %v482_v0 = vmul.f32 0.0078125, %v456_v55 }
 0x164   : > { %v606_v35 = vsel %vm605_vm6, %v1053_v13, %v602_v48  ;;  %v464_v1 = vpop.xlane.xlu1 %463  ;;  %v682_v4 = vmul.f32 %v1055_v23, %v681_v58  ;;  %vm643_vm10 = vweird.f32 %v1544_v47 }
 0x165   : > { %v789_v2 = vadd.f32 %v773_v57, %v757_v56  ;;  %v725_v3 = vmul.f32 %v1530_v20, %v606_v35  ;;  %v510_v37 = vsub.f32 %v478_v62, %v494_v60  ;;  %v514_v10 = vsub.f32 %v482_v0, %v498_v49 }
 0x166   : > { %v686_v13 = vsel %vm685_vm8, %v1055_v23, %v682_v4  ;;  %v1586_v60 = vmul.f32 0.0078125, %v1532_v28 }
 0x167   : > { %805 = vst [vmem:[%s1557_s10] sm:$0xff] %v789_v2  ;;  %v742_v11 = vmul.f32 %v725_v3, %v1513_v39  ;;  %v733_v14 = vmul.f32 %v1530_v20, %v686_v13  ;;  %v526_v15 = vmax.f32 %v510_v37, 0.0  ;;  %v530_v16 = vmax.f32 %v514_v10, 0.0 }
 0x168   : > { %v777_v19 = vmul.f32 %v725_v3, %v1413_v38 }
 0x169   : > { %v1057_v18 = vpop.eup %1056  ;;  %v761_v5 = vsub.f32 %v1539_v34, %v742_v11  ;;  %v750_v21 = vmul.f32 %v733_v14, %v1517_v52  ;;  %v1568_v23 = vadd.f32 1e-05, %v526_v15  ;;  %v1570_v30 = vadd.f32 1e-05, %v530_v16 }
 0x16a   : > { %v638_v24 = vmul.f32 %v1057_v18, %v1544_v47  ;;  %v1566_v25 = vpop.xlane.xlu2 %409  ;;  %v400_v29 = vpop.xlane.xlu0 %399  ;;  %v785_v32 = vmul.f32 %v733_v14, %v1422_v45  ;;  %v486_v52 = vmul.f32 0.0078125, %v464_v1  ;;  %vm644_vm9 = vweird.f32 %v1057_v18 }
 0x16b   : > { %v793_v39 = vadd.f32 %v777_v19, %v761_v5  ;;  %v769_v31 = vsub.f32 %v1539_v34, %v750_v21  ;;  %v1574_v40 = vmul.f32 0.0078125, %v400_v29  ;;  %1058 = vrsqrt.f32 %v1568_v23  ;;  %vm645_vm11 = vmor %vm643_vm10, %vm644_vm9 }
 0x16c   : > { %v639_v36 = vmul.f32 %v1057_v18, %v638_v24  ;;  %v458_v38 = vpop.xlane.xlu1 %457  ;;  %1060 = vrsqrt.f32 %v1570_v30  ;;  %v1600_v15 = vmul.f32 0.0078125, %v1521_v6  ;;  %v495_v29 = vmul.f32 %v1586_v60, %v1586_v60 }
 0x16d   : > { %809 = vst [vmem:[%s1557_s10 + $0x20] sm:$0xff] %v793_v39  ;;  %v801_v41 = vadd.f32 %v785_v32, %v769_v31  ;;  %v502_v44 = vmul.f32 %v1574_v40, %v1574_v40  ;;  %v483_v3 = vmul.f32 0.0078125, %v458_v38  ;;  %vm573_vm14 = vweird.f32 %v1568_v23 }
 0x16e   : > { %v640_v42 = vmul.f32 0.5, %v639_v36  ;;  %vm613_vm0 = vweird.f32 %v1570_v30 }
 0x16f   : > { %817 = vst [vmem:[%s1557_s10 + $0x60] sm:$0xff] %v801_v41  ;;  %v518_v48 = vsub.f32 %v486_v52, %v502_v44 }
 0x170   : > { %v641_v46 = vsub.f32 1.5, %v640_v42 }
 0x171   : > { %v534_v49 = vmax.f32 %v518_v48, 0.0  ;;  %v1059_v56 = vpop.eup %1058 }
 0x172   : > { %v642_v45 = vmul.f32 %v1057_v18, %v641_v46  ;;  %v466_v53 = vpop.xlane.xlu2 %465  ;;  %v394_v55 = vpop.xlane.xlu0 %393  ;;  %v568_v62 = vmul.f32 %v1059_v56, %v1568_v23  ;;  %vm574_vm12 = vweird.f32 %v1059_v56 }
 0x173   : > { %v1583_v57 = vmul.f32 0.0078125, %v394_v55  ;;  %v1061_v58 = vpop.eup %1060  ;;  %v1589_v0 = vadd.f32 1e-05, %v534_v49  ;;  %v487_v10 = vmul.f32 0.0078125, %v466_v53  ;;  %vm575_vm15 = vmor %vm573_vm14, %vm574_vm12 }
 0x174   : > { %v646_v35 = vsel %vm645_vm11, %v1057_v18, %v642_v45  ;;  %v402_v1 = vpop.xlane.xlu1 %401  ;;  %v608_v47 = vmul.f32 %v1061_v58, %v1570_v30  ;;  %v569_v37 = vmul.f32 %v1059_v56, %v568_v62  ;;  %vm614_vm13 = vweird.f32 %v1061_v58 }
 0x175   : > { %v729_v2 = vmul.f32 %v1530_v20, %v646_v35  ;;  %v499_v4 = vmul.f32 %v1583_v57, %v1583_v57  ;;  %1062 = vrsqrt.f32 %v1589_v0  ;;  %v1596_v11 = vmul.f32 0.0078125, %v402_v1  ;;  %vm615_vm1 = vmor %vm613_vm0, %vm614_vm13 }
 0x176   : > { %v609_v13 = vmul.f32 %v1061_v58, %v608_v47  ;;  %v570_v16 = vmul.f32 0.5, %v569_v37  ;;  %v1624_v30 = vmul.f32 %v1600_v15, %v1600_v15  ;;  %vm653_vm3 = vweird.f32 %v1589_v0 }
 0x177   : > { %v746_v28 = vmul.f32 %v729_v2, %v1523_v7  ;;  %v515_v14 = vsub.f32 %v483_v3, %v499_v4  ;;  %v503_v18 = vmul.f32 %v1596_v11, %v1596_v11  ;;  %v781_v19 = vmul.f32 %v729_v2, %v1431_v51 }
 0x178   : > { %v610_v21 = vmul.f32 0.5, %v609_v13  ;;  %v571_v7 = vsub.f32 1.5, %v570_v16  ;;  %v1629_v3 = vmul.f32 0.0078125, %v1566_v25 }
 0x179   : > { %v765_v5 = vsub.f32 %v1539_v34, %v746_v28  ;;  %v531_v24 = vmax.f32 %v515_v14, 0.0  ;;  %v519_v39 = vsub.f32 %v487_v10, %v503_v18 }
 0x17a   : > { %v460_v31 = vpop.xlane.xlu2 %459  ;;  %v450_v6 = vpop.xlane.xlu0 %449  ;;  %v611_v36 = vsub.f32 1.5, %v610_v21  ;;  %v572_v41 = vmul.f32 %v1059_v56, %v571_v7 }
 0x17b   : > { %v797_v32 = vadd.f32 %v781_v19, %v765_v5  ;;  %v1608_v38 = vadd.f32 1e-05, %v531_v24  ;;  %v1063_v52 = vpop.eup %1062  ;;  %v535_v51 = vmax.f32 %v519_v39, 0.0  ;;  %v479_v42 = vmul.f32 0.0078125, %v450_v6 }
 0x17c   : > { %v388_v44 = vpop.xlane.xlu1 %387  ;;  %v612_v46 = vmul.f32 %v1061_v58, %v611_v36  ;;  %v648_v48 = vmul.f32 %v1063_v52, %v1589_v0  ;;  %v576_v45 = vsel %vm575_vm15, %v1059_v56, %v572_v41  ;;  %vm654_vm2 = vweird.f32 %v1063_v52 }
 0x17d   : > { %813 = vst [vmem:[%s1557_s10 + $0x40] sm:$0xff] %v797_v32  ;;  %1064 = vrsqrt.f32 %v1608_v38  ;;  %v1617_v49 = vadd.f32 1e-05, %v535_v51  ;;  %v511_v53 = vsub.f32 %v479_v42, %v495_v29  ;;  %v722_v23 = vmul.f32 %v1530_v20, %v576_v45  ;;  %vm655_vm4 = vmor %vm653_vm3, %vm654_vm2 }
 0x17e   : > { %v616_v55 = vsel %vm615_vm1, %v1061_v58, %v612_v46  ;;  %v649_v35 = vmul.f32 %v1063_v52, %v648_v48  ;;  %v1635_v16 = vmul.f32 0.0078125, %v388_v44  ;;  %v484_v7 = vmul.f32 0.0078125, %v460_v31 }
 0x17f   : > { %v726_v62 = vmul.f32 %v1530_v20, %v616_v55  ;;  %1066 = vrsqrt.f32 %v1617_v49  ;;  %v527_v1 = vmax.f32 %v511_v53, 0.0  ;;  %v739_v56 = vmul.f32 %v722_v23, %v1542_v43 }
 0x180   : > { %v650_v2 = vmul.f32 0.5, %v649_v35  ;;  %v774_v13 = vmul.f32 %v722_v23, %v1429_v50  ;;  %vm623_vm5 = vweird.f32 %v1608_v38  ;;  %vm663_vm6 = vweird.f32 %v1617_v49 }
 0x181   : > { %v743_v47 = vmul.f32 %v726_v62, %v1534_v33  ;;  %v1631_v58 = vadd.f32 1e-05, %v527_v1  ;;  %v758_v28 = vsub.f32 %v1539_v34, %v739_v56  ;;  %v778_v33 = vmul.f32 %v726_v62, %v1441_v59 }
 0x182   : > { %v404_v4 = vpop.xlane.xlu2 %403  ;;  %v412_v37 = vpop.xlane.xlu0 %411  ;;  %v651_v14 = vsub.f32 1.5, %v650_v2  ;;  %v496_v36 = vmul.f32 %v1635_v16, %v1635_v16 }
 0x183   : > { %v1065_v10 = vpop.eup %1064  ;;  %v762_v43 = vsub.f32 %v1539_v34, %v743_v47  ;;  %1068 = vrsqrt.f32 %v1631_v58  ;;  %v790_v5 = vadd.f32 %v774_v13, %v758_v28  ;;  %v1642_v21 = vmul.f32 0.0078125, %v404_v4 }
 0x184   : > { %v618_v25 = vmul.f32 %v1065_v10, %v1608_v38  ;;  %v396_v18 = vpop.xlane.xlu1 %395  ;;  %v652_v19 = vmul.f32 %v1063_v52, %v651_v14  ;;  %vm624_vm7 = vweird.f32 %v1065_v10  ;;  %v1659_v51 = vmul.f32 0.0078125, %v412_v37 }
 0x185   : > { %v1067_v50 = vpop.eup %1066  ;;  %v794_v24 = vadd.f32 %v778_v33, %v762_v43  ;;  %v1645_v39 = vmul.f32 0.0078125, %v396_v18  ;;  %806 = vst [vmem:[%s1557_s10 + $0x8] sm:$0xff] %v790_v5  ;;  %vm625_vm9 = vmor %vm623_vm5, %vm624_vm7  ;;  %vm583_vm11 = vweird.f32 %v1631_v58 }
 0x186   : > { %v619_v29 = vmul.f32 %v1065_v10, %v618_v25  ;;  %v656_v59 = vsel %vm655_vm4, %v1063_v52, %v652_v19  ;;  %v658_v6 = vmul.f32 %v1067_v50, %v1617_v49  ;;  %v504_v52 = vmul.f32 %v1642_v21, %v1642_v21 }
 0x187   : > { %810 = vst [vmem:[%s1557_s10 + $0x28] sm:$0xff] %v794_v24  ;;  %v730_v0 = vmul.f32 %v1530_v20, %v656_v59  ;;  %v500_v31 = vmul.f32 %v1645_v39, %v1645_v39  ;;  %vm664_vm8 = vweird.f32 %v1067_v50 }
 0x188   : > { %v620_v32 = vmul.f32 0.5, %v619_v29  ;;  %v659_v41 = vmul.f32 %v1067_v50, %v658_v6  ;;  %vm665_vm10 = vmor %vm663_vm6, %vm664_vm8 }
 0x189   : > { %v1069_v42 = vpop.eup %1068  ;;  %v747_v44 = vmul.f32 %v730_v0, %v1574_v40  ;;  %v516_v48 = vsub.f32 %v484_v7, %v500_v31  ;;  %v782_v23 = vmul.f32 %v730_v0, %v1451_v63 }
 0x18a   : > { %v621_v46 = vsub.f32 1.5, %v620_v32  ;;  %v472_v45 = vpop.xlane.xlu2 %471  ;;  %v468_v53 = vpop.xlane.xlu0 %467  ;;  %v660_v55 = vmul.f32 0.5, %v659_v41  ;;  %v578_v35 = vmul.f32 %v1069_v42, %v1631_v58  ;;  %vm584_vm12 = vweird.f32 %v1069_v42 }
 0x18b   : > { %v490_v62 = vmul.f32 0.0078125, %v472_v45  ;;  %v766_v1 = vsub.f32 %v1539_v34, %v747_v44  ;;  %v532_v2 = vmax.f32 %v516_v48, 0.0  ;;  %v488_v47 = vmul.f32 0.0078125, %v468_v53  ;;  %vm585_vm13 = vmor %vm583_vm11, %vm584_vm12 }
 0x18c   : > { %v622_v56 = vmul.f32 %v1065_v10, %v621_v46  ;;  %v452_v4 = vpop.xlane.xlu1 %451  ;;  %v661_v40 = vsub.f32 1.5, %v660_v55  ;;  %v579_v37 = vmul.f32 %v1069_v42, %v578_v35  ;;  %v508_v58 = vmul.f32 %v1659_v51, %v1659_v51 }
 0x18d   : > { %v522_v28 = vsub.f32 %v490_v62, %v1624_v30  ;;  %v480_v63 = vmul.f32 0.0078125, %v452_v4  ;;  %v798_v13 = vadd.f32 %v782_v23, %v766_v1  ;;  %v1669_v43 = vadd.f32 1e-05, %v532_v2 }
 0x18e   : > { %v626_v14 = vsel %vm625_vm9, %v1065_v10, %v622_v56  ;;  %v520_v33 = vsub.f32 %v488_v47, %v504_v52  ;;  %v662_v18 = vmul.f32 %v1067_v50, %v661_v40  ;;  %v580_v5 = vmul.f32 0.5, %v579_v37 }
 0x18f   : > { %v727_v25 = vmul.f32 %v1530_v20, %v626_v14  ;;  %v538_v19 = vmax.f32 %v522_v28, 0.0  ;;  %814 = vst [vmem:[%s1557_s10 + $0x48] sm:$0xff] %v798_v13  ;;  %1070 = vrsqrt.f32 %v1669_v43  ;;  %v512_v30 = vsub.f32 %v480_v63, %v496_v36 }
 0x190   : > { %v536_v38 = vmax.f32 %v520_v33, 0.0  ;;  %v666_v24 = vsel %vm665_vm10, %v1067_v50, %v662_v18  ;;  %v581_v29 = vsub.f32 1.5, %v580_v5  ;;  %vm633_vm15 = vweird.f32 %v1669_v43 }
 0x191   : > { %v744_v10 = vmul.f32 %v727_v25, %v1583_v57  ;;  %v731_v7 = vmul.f32 %v1530_v20, %v666_v24  ;;  %v1680_v59 = vadd.f32 1e-05, %v538_v19  ;;  %v528_v0 = vmax.f32 %v512_v30, 0.0 }
 0x192   : > { %v1682_v6 = vadd.f32 1e-05, %v536_v38  ;;  %v474_v49 = vpop.xlane.xlu0 %473  ;;  %v779_v31 = vmul.f32 %v727_v25, %v1462_v8  ;;  %v582_v41 = vmul.f32 %v1069_v42, %v581_v29  ;;  %v507_v57 = vmul.f32 %v1629_v3, %v1629_v3 }
 0x193   : > { %v763_v32 = vsub.f32 %v1539_v34, %v744_v10  ;;  %v491_v36 = vmul.f32 0.0078125, %v474_v49  ;;  %v748_v50 = vmul.f32 %v731_v7, %v1596_v11  ;;  %1072 = vrsqrt.f32 %v1680_v59 }
 0x194   : > { %v476_v52 = vpop.xlane.xlu1 %475  ;;  %v783_v46 = vmul.f32 %v731_v7, %v1473_v12  ;;  %v586_v48 = vsel %vm585_vm13, %v1069_v42, %v582_v41  ;;  %1074 = vrsqrt.f32 %v1682_v6  ;;  %v1696_v23 = vadd.f32 1e-05, %v528_v0 }
 0x195   : > { %v795_v44 = vadd.f32 %v779_v31, %v763_v32  ;;  %v1071_v8 = vpop.eup %1070  ;;  %v767_v45 = vsub.f32 %v1539_v34, %v748_v50  ;;  %v723_v53 = vmul.f32 %v1530_v20, %v586_v48  ;;  %v523_v11 = vsub.f32 %v491_v36, %v507_v57 }
 0x196   : > { %v628_v55 = vmul.f32 %v1071_v8, %v1669_v43  ;;  %v492_v35 = vmul.f32 0.0078125, %v476_v52  ;;  %1076 = vrsqrt.f32 %v1696_v23  ;;  %vm634_vm14 = vweird.f32 %v1071_v8 }
 0x197   : > { %811 = vst [vmem:[%s1557_s10 + $0x30] sm:$0xff] %v795_v44  ;;  %v799_v12 = vadd.f32 %v783_v46, %v767_v45  ;;  %v740_v42 = vmul.f32 %v723_v53, %v1586_v60  ;;  %v539_v1 = vmax.f32 %v523_v11, 0.0  ;;  %v775_v4 = vmul.f32 %v723_v53, %v1445_v61  ;;  %vm635_vm0 = vmor %vm633_vm15, %vm634_vm14 }
 0x198   : > { %v629_v62 = vmul.f32 %v1071_v8, %v628_v55  ;;  %v524_v56 = vsub.f32 %v492_v35, %v508_v58  ;;  %vm693_vm3 = vweird.f32 %v1680_v59  ;;  %vm673_vm5 = vweird.f32 %v1682_v6 }
 0x199   : > { %v1073_v2 = vpop.eup %1072  ;;  %815 = vst [vmem:[%s1557_s10 + $0x50] sm:$0xff] %v799_v12  ;;  %v759_v47 = vsub.f32 %v1539_v34, %v740_v42  ;;  %v1708_v63 = vadd.f32 1e-05, %v539_v1  ;;  %vm593_vm8 = vweird.f32 %v1696_v23 }
 0x19a   : > { %v1075_v40 = vpop.eup %1074  ;;  %v630_v37 = vmul.f32 0.5, %v629_v62  ;;  %v688_v28 = vmul.f32 %v1073_v2, %v1680_v59  ;;  %v540_v14 = vmax.f32 %v524_v56, 0.0  ;;  %vm694_vm1 = vweird.f32 %v1073_v2 }
 0x19b   : > { %v791_v13 = vadd.f32 %v775_v4, %v759_v47  ;;  %v668_v60 = vmul.f32 %v1075_v40, %v1682_v6  ;;  %1078 = vrsqrt.f32 %v1708_v63  ;;  %vm674_vm2 = vweird.f32 %v1075_v40  ;;  %vm695_vm4 = vmor %vm693_vm3, %vm694_vm1 }
 0x19c   : > { %v631_v33 = vsub.f32 1.5, %v630_v37  ;;  %v689_v25 = vmul.f32 %v1073_v2, %v688_v28  ;;  %v1077_v18 = vpop.eup %1076  ;;  %v1713_v19 = vadd.f32 1e-05, %v540_v14  ;;  %vm675_vm6 = vmor %vm673_vm5, %vm674_vm2  ;;  %vm703_vm11 = vweird.f32 %v1708_v63 }
 0x19d   : > { %807 = vst [vmem:[%s1557_s10 + $0x10] sm:$0xff] %v791_v13  ;;  %v669_v5 = vmul.f32 %v1075_v40, %v668_v60  ;;  %v588_v30 = vmul.f32 %v1077_v18, %v1696_v23  ;;  %vm594_vm7 = vweird.f32 %v1077_v18 }
 0x19e   : > { %v632_v61 = vmul.f32 %v1071_v8, %v631_v33  ;;  %v690_v38 = vmul.f32 0.5, %v689_v25  ;;  %1080 = vrsqrt.f32 %v1713_v19  ;;  %vm595_vm9 = vmor %vm593_vm8, %vm594_vm7  ;;  %vm713_vm14 = vweird.f32 %v1713_v19 }
 0x19f   : > { %v670_v10 = vmul.f32 0.5, %v669_v5  ;;  %v589_v7 = vmul.f32 %v1077_v18, %v588_v30 }
 0x1a0   : > { %v636_v24 = vsel %vm635_vm0, %v1071_v8, %v632_v61  ;;  %v691_v29 = vsub.f32 1.5, %v690_v38 }
 0x1a1   : > { %v728_v0 = vmul.f32 %v1530_v20, %v636_v24  ;;  %v671_v49 = vsub.f32 1.5, %v670_v10  ;;  %v1079_v32 = vpop.eup %1078  ;;  %v590_v43 = vmul.f32 0.5, %v589_v7 }
 0x1a2   : > { %v692_v31 = vmul.f32 %v1073_v2, %v691_v29  ;;  %v698_v57 = vmul.f32 %v1079_v32, %v1708_v63  ;;  %vm704_vm10 = vweird.f32 %v1079_v32 }
 0x1a3   : > { %v745_v41 = vmul.f32 %v728_v0, %v1645_v39  ;;  %v672_v36 = vmul.f32 %v1075_v40, %v671_v49  ;;  %v780_v50 = vmul.f32 %v728_v0, %v1480_v17  ;;  %v591_v44 = vsub.f32 1.5, %v590_v43  ;;  %vm705_vm12 = vmor %vm703_vm11, %vm704_vm10 }
 0x1a4   : > { %v696_v52 = vsel %vm695_vm4, %v1073_v2, %v692_v31  ;;  %v1081_v46 = vpop.eup %1080  ;;  %v699_v39 = vmul.f32 %v1079_v32, %v698_v57 }
 0x1a5   : > { %v764_v48 = vsub.f32 %v1539_v34, %v745_v41  ;;  %v734_v59 = vmul.f32 %v1530_v20, %v696_v52  ;;  %v676_v8 = vsel %vm675_vm6, %v1075_v40, %v672_v36  ;;  %v592_v53 = vmul.f32 %v1077_v18, %v591_v44 }
 0x1a6   : > { %v732_v45 = vmul.f32 %v1530_v20, %v676_v8  ;;  %v708_v6 = vmul.f32 %v1081_v46, %v1713_v19  ;;  %v700_v58 = vmul.f32 0.5, %v699_v39  ;;  %vm714_vm13 = vweird.f32 %v1081_v46 }
 0x1a7   : > { %v796_v17 = vadd.f32 %v780_v50, %v764_v48  ;;  %v751_v11 = vmul.f32 %v734_v59, %v1600_v15  ;;  %v596_v35 = vsel %vm595_vm9, %v1077_v18, %v592_v53  ;;  %v786_v62 = vmul.f32 %v734_v59, %v1434_v54  ;;  %vm715_vm15 = vmor %vm713_vm14, %vm714_vm13 }
 0x1a8   : > { %v749_v55 = vmul.f32 %v732_v45, %v1642_v21  ;;  %v709_v12 = vmul.f32 %v1081_v46, %v708_v6  ;;  %v724_v23 = vmul.f32 %v1530_v20, %v596_v35  ;;  %v701_v1 = vsub.f32 1.5, %v700_v58 }
 0x1a9   : > { %812 = vst [vmem:[%s1557_s10 + $0x38] sm:$0xff] %v796_v17  ;;  %v770_v42 = vsub.f32 %v1539_v34, %v751_v11  ;;  %v784_v15 = vmul.f32 %v732_v45, %v1495_v26 }
 0x1aa   : > { %v768_v56 = vsub.f32 %v1539_v34, %v749_v55  ;;  %v710_v2 = vmul.f32 0.5, %v709_v12  ;;  %v741_v47 = vmul.f32 %v724_v23, %v1635_v16  ;;  %v702_v4 = vmul.f32 %v1079_v32, %v701_v1 }
 0x1ab   : > { %v802_v21 = vadd.f32 %v786_v62, %v770_v42  ;;  %v776_v28 = vmul.f32 %v724_v23, %v1487_v22 }
 0x1ac   : > { %v800_v40 = vadd.f32 %v784_v15, %v768_v56  ;;  %v711_v54 = vsub.f32 1.5, %v710_v2  ;;  %v760_v37 = vsub.f32 %v1539_v34, %v741_v47  ;;  %v706_v13 = vsel %vm705_vm12, %v1079_v32, %v702_v4 }
 0x1ad   : > { %818 = vst [vmem:[%s1557_s10 + $0x68] sm:$0xff] %v802_v21  ;;  %v735_v26 = vmul.f32 %v1530_v20, %v706_v13 }
 0x1ae   : > { %816 = vst [vmem:[%s1557_s10 + $0x58] sm:$0xff] %v800_v40  ;;  %v712_v16 = vmul.f32 %v1081_v46, %v711_v54  ;;  %v792_v63 = vadd.f32 %v776_v28, %v760_v37 }
 0x1af   : > { %v752_v60 = vmul.f32 %v735_v26, %v1629_v3  ;;  %v787_v25 = vmul.f32 %v735_v26, %v1465_v9 }
 0x1b0   : > { %v716_v14 = vsel %vm715_vm15, %v1081_v46, %v712_v16  ;;  %808 = vst [vmem:[%s1557_s10 + $0x18] sm:$0xff] %v792_v63 }
 0x1b1   : > { %v736_v22 = vmul.f32 %v1530_v20, %v716_v14  ;;  %v771_v33 = vsub.f32 %v1539_v34, %v752_v60 }
 0x1b3   : > { %v753_v18 = vmul.f32 %v736_v22, %v1659_v51  ;;  %v803_v3 = vadd.f32 %v787_v25, %v771_v33  ;;  %v788_v19 = vmul.f32 %v736_v22, %v1498_v27 }
 0x1b5   : > { %v772_v5 = vsub.f32 %v1539_v34, %v753_v18  ;;  %819 = vst [vmem:[%s1557_s10 + $0x70] sm:$0xff] %v803_v3 }
 0x1b7   : > { %v804_v61 = vadd.f32 %v788_v19, %v772_v5 }
 0x1b9   : > { %820 = vst [vmem:[%s1557_s10 + $0x78] sm:$0xff] %v804_v61 }
 0x1ba   : > { %1169 = shalt.err (!%p1166_p10)
}
 0x1bb   : > { %s1217_s28 = smov 128   ;;  %s1218_s6 = smov 8  }
 0x1bc   : > { %992 = dma.vmem_to_hbm [thread:$0]  (%p1318_p3), %s835_s22, 2048, %s837_s14, %s822_s8, %s1217_s28, %s1217_s28, %s1218_s6  }
 0x1bd PF: > { %s851_s10 = sand.u32 1, %s1200_s18   ;;  %p1803_p12 = scmp.ge.s32.totalorder %s1212_s21, 2 }
 0x1be   : > { %s852_s17 = scalar_lea.sflag [#allocation4], %s851_s10 }
 0x1bf   : > { %p1003_p13 = pnand %p1803_p12, %p1284_p6 }
 0x1c1   : > { %p1004_p0 = pneg %p1003_p13 }
 0x1c3   : > { %1195 = dma.done.wait (%p1004_p0), %s852_s17, 2048  }
 0x1c4   : > { %1197 = vsyncadd (%p1004_p0), %s852_s17, 4294965248  ;;  %p19_p5 = scmp.ge.s32.totalorder %s1302_s7, 4   ;;  %s1804_s18 = smov %s1204_s19 }
 0x1c5   : > { %s1805_s19 = smov %s1208_s20  ;;  %s1806_s20 = smov %s1314_s12 }
 0x1c6   : > { %s1807_s21 = smov %s1302_s7  ;;  %21 = sbr.rel (!%p19_p5) target bundleno = 6 (0x6), region = 89 }
 0x1cb   :  { %858 = vsyncpa [#allocation3], 1 }
 0x1cc   :  { %860 = vsyncpa [#allocation3 + $0x1], 1 }
 0x1cd   :  { %861 = vsyncpa [#allocation6], 1 }
 0x1ce   :  { %862 = vsyncpa [#allocation4], 1 }
 0x1cf   :  { %864 = vsyncpa [#allocation4 + $0x1], 1 }

</bundles_post_ra>
